<compile_context>
chip_gen: v7x
topology: tpu7x:2x2x1
jax: 0.10.0
libtpu: 0.0.40
codegen_flags: <defaults>
</compile_context>

<pallas_src>
import numpy as np

import jax
import jax.numpy as jnp
from jax.experimental import pallas as pl
from jax.experimental.pallas import tpu as pltpu


# ---------------------------------------------------------------------------
# VMEM-budget-driven lane chunking.
# ---------------------------------------------------------------------------
def _choose_num_lane_chunks(n_outer, total_lanes, bytes_per_lane, *,
                            block_budget=2 << 20, min_total_steps=8,
                            min_block_bytes=128 << 10, lane_quantum=128):
    """Split the lane (last) axis into chunks such that
      * each chunk divides total_lanes and is a multiple of lane_quantum
        (unless it is the whole axis, keeping the (8,128) tiling rule),
      * the per-step block stays under `block_budget` so double-buffered in+out
        blocks fit comfortably inside the scoped VMEM of v5e/v6e/v7x,
      * the grid gets >= min_total_steps steps when the data is big enough, so each
        of v7x's two TensorCores sees several pipelined steps."""
    cands = []
    for nc in range(1, total_lanes + 1):
        if total_lanes % nc:
            continue
        chunk = total_lanes // nc
        if nc != 1 and chunk % lane_quantum:
            continue
        cands.append((nc, chunk * bytes_per_lane))
    fits = [c for c in cands if c[1] <= block_budget]
    good = [c for c in fits
            if n_outer * c[0] >= min_total_steps and c[1] >= min_block_bytes]
    if good:
        return min(nc for nc, _ in good)   # biggest block that still gives enough steps
    if fits:
        return min(nc for nc, _ in fits)   # biggest block under budget
    return max(nc for nc, _ in cands)      # nothing fits: smallest legal block


# ---------------------------------------------------------------------------
# Kernel A: coarse attention map
#   att = sigmoid( Wpsi @ relu(Wtheta @ xs + Wphi @ g + b_phi) + b_psi )
# xs is the space-to-depth (im2col) view of x for the 2x2x2/stride-2 theta conv.
# Grid = (N, St-chunks); operands are (channels, coarse-spatial) so the lane axis
# is the dense coarse-spatial chunk.
# ---------------------------------------------------------------------------
def _attention_coarse_kernel(xs_ref, g_ref, wt_ref, wp_ref, bphi_ref,
                             wpsi_ref, bpsi_ref, att_ref):
    theta_x = jnp.dot(wt_ref[...], xs_ref[...],
                      preferred_element_type=jnp.float32)              # (Ci, stc)
    phi_g = jnp.dot(wp_ref[...], g_ref[...],
                    preferred_element_type=jnp.float32) + bphi_ref[...]
    f = jnp.maximum(theta_x + phi_g, 0.0)                              # relu
    logits = jnp.dot(wpsi_ref[...], f,
                     preferred_element_type=jnp.float32) + bpsi_ref[...]  # (1, stc)
    att_ref[...] = 1.0 / (1.0 + jnp.exp(-logits))                      # sigmoid


def attention_coarse(xs, g2, wt, wp, bphi, wpsi, bpsi, n_chunks):
    N, K8, St = xs.shape
    Cg = g2.shape[1]
    Ci = wt.shape[0]
    stc = St // n_chunks
    return pl.pallas_call(
        _attention_coarse_kernel,
        out_shape=jax.ShapeDtypeStruct((N, 1, St), jnp.float32),
        grid=(N, n_chunks),
        in_specs=[
            pl.BlockSpec((None, K8, stc), lambda n, j: (n, 0, j)),
            pl.BlockSpec((None, Cg, stc), lambda n, j: (n, 0, j)),
            pl.BlockSpec((Ci, K8), lambda n, j: (0, 0)),
            pl.BlockSpec((Ci, Cg), lambda n, j: (0, 0)),
            pl.BlockSpec((Ci, 1), lambda n, j: (0, 0)),
            pl.BlockSpec((1, Ci), lambda n, j: (0, 0)),
            pl.BlockSpec((1, 1), lambda n, j: (0, 0)),
        ],
        out_specs=pl.BlockSpec((None, 1, stc), lambda n, j: (n, 0, j)),
        compiler_params=pltpu.CompilerParams(
            dimension_semantics=("parallel", "parallel")),
    )(xs, g2, wt, wp, bphi, wpsi, bpsi)


# ---------------------------------------------------------------------------
# Kernel U: trilinear x2 upsample of the (tiny) coarse attention map, done once per
# batch element via two small matmuls against precomputed interpolation operators.
# ---------------------------------------------------------------------------
def _att_upsample_kernel(att_ref, khwT_ref, ud_ref, up_ref):
    s1 = jnp.dot(att_ref[...], khwT_ref[...],
                 preferred_element_type=jnp.float32)            # (Dt, H*W)
    up_ref[...] = jnp.dot(ud_ref[...], s1,
                          preferred_element_type=jnp.float32)   # (D, H*W)


def att_upsample(att3, khwT, ud):
    N, Dt, HtWt = att3.shape
    D, HW = ud.shape[0], khwT.shape[1]
    # TODO(synk): at very large plane sizes khwT (HtWt,HW) grows quadratically; switch
    # to fully separable 1-D H/W operators if this kernel's VMEM ever becomes binding.
    return pl.pallas_call(
        _att_upsample_kernel,
        out_shape=jax.ShapeDtypeStruct((N, D, HW), jnp.float32),
        grid=(N,),
        in_specs=[
            pl.BlockSpec((None, Dt, HtWt), lambda n: (n, 0, 0)),
            pl.BlockSpec((HtWt, HW), lambda n: (0, 0)),
            pl.BlockSpec((D, Dt), lambda n: (0, 0)),
        ],
        out_specs=pl.BlockSpec((None, D, HW), lambda n: (n, 0, 0)),
        compiler_params=pltpu.CompilerParams(
            dimension_semantics=("parallel",)),
    )(att3, khwT, ud)


# ---------------------------------------------------------------------------
# Kernel B: gating + 1x1x1 W-conv + per-channel BatchNorm statistics (single x pass,
# no big output).  Gating commutes with the 1x1 conv:  W(att*x)+b = att*(Wx)+b.
# Grid = (N, S-chunks); each step is one (C, schunk) lane-dense slab and one MXU matmul.
# ---------------------------------------------------------------------------
def _gate_wconv_stats_kernel(x_ref, att_ref, wc_ref, bc_ref, s_ref, q_ref):
    z = jnp.dot(wc_ref[...], x_ref[...], preferred_element_type=jnp.float32)  # (C, sc)
    wy = z * att_ref[...] + bc_ref[...]        # (1, sc) att broadcasts over channels
    s_ref[...] = jnp.sum(wy, axis=1, keepdims=True)
    q_ref[...] = jnp.sum(wy * wy, axis=1, keepdims=True)


def gate_wconv_stats(x2, att_up2, wc, bc, n_chunks):
    N, C, S = x2.shape
    sc = S // n_chunks
    return pl.pallas_call(
        _gate_wconv_stats_kernel,
        out_shape=(
            jax.ShapeDtypeStruct((N * n_chunks, C, 1), jnp.float32),   # channel sums
            jax.ShapeDtypeStruct((N * n_chunks, C, 1), jnp.float32),   # channel sumsq
        ),
        grid=(N, n_chunks),
        in_specs=[
            pl.BlockSpec((None, C, sc), lambda n, j: (n, 0, j)),
            pl.BlockSpec((None, 1, sc), lambda n, j: (n, 0, j)),
            pl.BlockSpec((C, C), lambda n, j: (0, 0)),
            pl.BlockSpec((C, 1), lambda n, j: (0, 0)),
        ],
        out_specs=(
            pl.BlockSpec((None, C, 1), lambda n, j: (n * n_chunks + j, 0, 0)),
            pl.BlockSpec((None, C, 1), lambda n, j: (n * n_chunks + j, 0, 0)),
        ),
        compiler_params=pltpu.CompilerParams(
            dimension_semantics=("parallel", "parallel")),
    )(x2, att_up2, wc, bc)


# ---------------------------------------------------------------------------
# Kernel C: re-read x + att_up and apply gate + 1x1x1 conv with the BN-folded weights
# (out = att * (W_fold @ x) + b_fold), writing the final W_y directly.
# ---------------------------------------------------------------------------
def _gate_wconv_apply_kernel(x_ref, att_ref, wf_ref, bf_ref, o_ref):
    z = jnp.dot(wf_ref[...], x_ref[...], preferred_element_type=jnp.float32)
    o_ref[...] = z * att_ref[...] + bf_ref[...]


def gate_wconv_apply(x2, att_up2, wf, bf, n_chunks):
    N, C, S = x2.shape
    sc = S // n_chunks
    return pl.pallas_call(
        _gate_wconv_apply_kernel,
        out_shape=jax.ShapeDtypeStruct((N, C, S), jnp.float32),
        grid=(N, n_chunks),
        in_specs=[
            pl.BlockSpec((None, C, sc), lambda n, j: (n, 0, j)),
            pl.BlockSpec((None, 1, sc), lambda n, j: (n, 0, j)),
            pl.BlockSpec((C, C), lambda n, j: (0, 0)),
            pl.BlockSpec((C, 1), lambda n, j: (0, 0)),
        ],
        out_specs=pl.BlockSpec((None, C, sc), lambda n, j: (n, 0, j)),
        compiler_params=pltpu.CompilerParams(
            dimension_semantics=("parallel", "parallel")),
    )(x2, att_up2, wf, bf)


# ---------------------------------------------------------------------------
# Host-side helpers (layout plumbing / tiny constants only).
# ---------------------------------------------------------------------------
def _linear_interp_matrix(out_size, in_size):
    """Dense operator for F.interpolate(mode='linear', align_corners=False)."""
    m = np.zeros((out_size, in_size), np.float32)
    if out_size == in_size:
        np.fill_diagonal(m, 1.0)
        return m
    ratio = in_size / out_size
    for o in range(out_size):
        real = max(ratio * (o + 0.5) - 0.5, 0.0)
        i0 = min(int(np.floor(real)), in_size - 1)
        i1 = min(i0 + 1, in_size - 1)
        lam = real - i0
        m[o, i0] += 1.0 - lam
        m[o, i1] += lam
    return m


@jax.jit
def grid_attention_block_3d(x, g, params):
    """x: (N, C, D, H, W); g: (N, Cg, D//2, H//2, W//2).  Returns (W_y, sigm_psi_f)."""
    N, C, D, H, W = x.shape
    Ng, Cg, Dg, Hg, Wg = g.shape
    assert N == Ng and D % 2 == 0 and H % 2 == 0 and W % 2 == 0
    Dt, Ht, Wt = D // 2, H // 2, W // 2
    # TODO(synk): only sub_sample_factor=(2,2,2) with g already on theta_x's grid (the
    # standard attention-U-Net wiring, where the phi_g upsample is exact identity) is
    # implemented; other modes/sizes are not.
    assert (Dg, Hg, Wg) == (Dt, Ht, Wt)
    St, S, HW = Dt * Ht * Wt, D * H * W, H * W

    # --- layout plumbing (wrapper-side reshapes, lane-dense slabs) ---
    # TODO(synk): the im2col transpose below still materializes an x-sized tensor in HBM
    # (~2 extra passes of x); fold it into Kernel A's input DMA (allow_input_fusion) or
    # in-kernel tap extraction in a follow-up.
    xs = x.reshape(N, C, Dt, 2, Ht, 2, Wt, 2)
    xs = xs.transpose(0, 1, 3, 5, 7, 2, 4, 6).reshape(N, C * 8, St)   # taps (c,kd,kh,kw)
    g2 = g.reshape(N, Cg, St)
    x2 = x.reshape(N, C, S)

    # 1-D trilinear (align_corners=False) upsample operators; H and W combined (kron).
    ud = jnp.asarray(_linear_interp_matrix(D, Dt))                               # (D, Dt)
    khwT = jnp.asarray(
        np.kron(_linear_interp_matrix(H, Ht), _linear_interp_matrix(W, Wt)).T)   # (HtWt, HW)

    # --- Kernel A: coarse attention map ---
    nst = _choose_num_lane_chunks(N, St, (8 * C + Cg + 2) * 4)
    att_c = attention_coarse(
        xs, g2,
        params["w_theta"].reshape(-1, C * 8),      # (Ci, C, 2, 2, 2) -> (Ci, 8*C)
        params["w_phi"], params["b_phi"][:, None],
        params["w_psi"], params["b_psi"].reshape(1, 1),
        nst)
    att3 = att_c.reshape(N, Dt, Ht * Wt)

    # --- Kernel U: trilinear x2 upsample of the attention map (tiny) ---
    att_up = att_upsample(att3, khwT, ud)          # (N, D, HW)
    att_up2 = att_up.reshape(N, 1, S)              # free reshape, lane-dense row

    # --- Kernel B: gate + 1x1x1 W-conv + BN statistics (reads x once, no big output) ---
    nc = _choose_num_lane_chunks(N, S, (2 * C + 1) * 4)
    s_p, q_p = gate_wconv_stats(x2, att_up2, params["w_w"], params["b_w"][:, None], nc)

    # --- fold BatchNorm3d (training mode: biased batch statistics) into the W-conv ---
    count = jnp.float32(N * S)
    mean = jnp.sum(s_p, axis=(0, 2)) / count
    var = jnp.maximum(jnp.sum(q_p, axis=(0, 2)) / count - mean * mean, 0.0)
    scale = params["gamma"] / jnp.sqrt(var + 1e-5)
    shift = params["beta"] - mean * scale
    w_fold = scale[:, None] * params["w_w"]                    # (C, C)
    b_fold = (scale * params["b_w"] + shift)[:, None]          # (C, 1)

    # --- Kernel C: recompute gate + conv with folded weights, write final W_y ---
    w_y = gate_wconv_apply(x2, att_up2, w_fold, b_fold, nc)

    return (w_y.reshape(N, C, D, H, W),
            att_up.reshape(N, 1, D, H, W))


if __name__ == "__main__":
    # in_channels=32, gating_channels=32, inter_channels=16, spatial 16^3, g on the
    # theta grid (8^3) -- the standard attention-U-Net wiring.
    N, C, Cg = 2, 32, 32
    D = H = W = 16
    Ci = C // 2

    key = jax.random.PRNGKey(0)
    kx, kg, k1, k2, k3, k4, k5 = jax.random.split(key, 7)

    x = jax.random.normal(kx, (N, C, D, H, W), dtype=jnp.float32)
    g = jax.random.normal(kg, (N, Cg, D // 2, H // 2, W // 2), dtype=jnp.float32)

    params = {
        # conv weights (1x1x1 kernels stored with their trailing singleton dims dropped)
        "w_theta": 0.1 * jax.random.normal(k1, (Ci, C, 2, 2, 2), jnp.float32),
        "w_phi":   0.1 * jax.random.normal(k2, (Ci, Cg), jnp.float32),
        "b_phi":   0.05 * jax.random.normal(k3, (Ci,), jnp.float32),
        "w_psi":   0.1 * jax.random.normal(k4, (1, Ci), jnp.float32),
        "b_psi":   jnp.zeros((1,), jnp.float32),
        "w_w":     0.1 * jax.random.normal(k5, (C, C), jnp.float32),
        "b_w":     jnp.zeros((C,), jnp.float32),
        # BatchNorm3d affine parameters (kaiming init: weight ~ N(1, 0.02), bias = 0)
        "gamma":   jnp.ones((C,), jnp.float32),
        "beta":    jnp.zeros((C,), jnp.float32),
    }

    w_y, att = grid_attention_block_3d(x, g, params)
    jax.block_until_ready((w_y, att))
    assert w_y.shape == (N, C, D, H, W)
    assert att.shape == (N, 1, D, H, W)
    assert bool(jnp.all(jnp.isfinite(w_y)))
    assert bool(jnp.all((att >= 0.0) & (att <= 1.0)))
    print("KERNEL_OK")
</pallas_src>

<mosaic_0001>
module attributes {stable_mosaic.version = 11 : i64} {
  func.func @_attention_coarse_kernel(%arg0: i32, %arg1: i32, %arg2: memref<1x256x128xf32, #tpu.memory_space<vmem>>, %arg3: memref<1x32x128xf32, #tpu.memory_space<vmem>>, %arg4: memref<16x256xf32, #tpu.memory_space<vmem>>, %arg5: memref<16x32xf32, #tpu.memory_space<vmem>>, %arg6: memref<16x1xf32, #tpu.memory_space<vmem>>, %arg7: memref<1x16xf32, #tpu.memory_space<vmem>>, %arg8: memref<1x1xf32, #tpu.memory_space<vmem>>, %arg9: memref<1x1x128xf32, #tpu.memory_space<vmem>>) attributes {dimension_semantics = [#tpu.dimension_semantics<parallel>, #tpu.dimension_semantics<parallel>], iteration_bounds = array<i64: 2, 4>, scalar_prefetch = 0 : i64, scratch_operands = 0 : i64, tpu.core_type = #tpu.core_type<tc>, window_params = [{transform_indices = @transform_0, window_bounds = array<i64: 1, 256, 128>}, {transform_indices = @transform_1, window_bounds = array<i64: 1, 32, 128>}, {pipeline_mode = #tpu.pipeline_mode<synchronous>, transform_indices = @transform_2, window_bounds = array<i64: 16, 256>}, {pipeline_mode = #tpu.pipeline_mode<synchronous>, transform_indices = @transform_3, window_bounds = array<i64: 16, 32>}, {pipeline_mode = #tpu.pipeline_mode<synchronous>, transform_indices = @transform_4, window_bounds = array<i64: 16, 1>}, {pipeline_mode = #tpu.pipeline_mode<synchronous>, transform_indices = @transform_5, window_bounds = array<i64: 1, 16>}, {pipeline_mode = #tpu.pipeline_mode<synchronous>, transform_indices = @transform_6, window_bounds = array<i64: 1, 1>}, {transform_indices = @transform_7, window_bounds = array<i64: 1, 1, 128>}]} {
    %c0 = arith.constant 0 : index
    %c0_0 = arith.constant 0 : index
    %0 = vector.load %arg4[%c0, %c0_0] : memref<16x256xf32, #tpu.memory_space<vmem>>, vector<16x256xf32>
    %c0_1 = arith.constant 0 : index
    %c0_2 = arith.constant 0 : index
    %c0_3 = arith.constant 0 : index
    %1 = vector.load %arg2[%c0_1, %c0_2, %c0_3] : memref<1x256x128xf32, #tpu.memory_space<vmem>>, vector<1x256x128xf32>
    %2 = vector.shape_cast %1 : vector<1x256x128xf32> to vector<256x128xf32>
    %cst = arith.constant dense<0.000000e+00> : vector<16x128xf32>
    %3 = tpu.matmul %0, %2, %cst {dimension_numbers = #tpu.dot_dimension_numbers<[1], [0], [0], [1], [0, 0, 1, 1], [], []>} : vector<16x256xf32>, vector<256x128xf32>, vector<16x128xf32> -> vector<16x128xf32>
    %c0_4 = arith.constant 0 : index
    %c0_5 = arith.constant 0 : index
    %4 = vector.load %arg5[%c0_4, %c0_5] : memref<16x32xf32, #tpu.memory_space<vmem>>, vector<16x32xf32>
    %c0_6 = arith.constant 0 : index
    %c0_7 = arith.constant 0 : index
    %c0_8 = arith.constant 0 : index
    %5 = vector.load %arg3[%c0_6, %c0_7, %c0_8] : memref<1x32x128xf32, #tpu.memory_space<vmem>>, vector<1x32x128xf32>
    %6 = vector.shape_cast %5 : vector<1x32x128xf32> to vector<32x128xf32>
    %cst_9 = arith.constant dense<0.000000e+00> : vector<16x128xf32>
    %7 = tpu.matmul %4, %6, %cst_9 {dimension_numbers = #tpu.dot_dimension_numbers<[1], [0], [0], [1], [0, 0, 1, 1], [], []>} : vector<16x32xf32>, vector<32x128xf32>, vector<16x128xf32> -> vector<16x128xf32>
    %c0_10 = arith.constant 0 : index
    %c0_11 = arith.constant 0 : index
    %8 = vector.load %arg6[%c0_10, %c0_11] : memref<16x1xf32, #tpu.memory_space<vmem>>, vector<16x1xf32>
    %9 = vector.broadcast %8 : vector<16x1xf32> to vector<16x128xf32>
    %10 = arith.addf %7, %9 : vector<16x128xf32>
    %11 = arith.addf %3, %10 : vector<16x128xf32>
    %cst_12 = arith.constant 0.000000e+00 : f32
    %12 = vector.broadcast %cst_12 : f32 to vector<16x128xf32>
    %13 = arith.maximumf %11, %12 : vector<16x128xf32>
    %c0_13 = arith.constant 0 : index
    %c0_14 = arith.constant 0 : index
    %14 = vector.load %arg7[%c0_13, %c0_14] : memref<1x16xf32, #tpu.memory_space<vmem>>, vector<1x16xf32>
    %cst_15 = arith.constant dense<0.000000e+00> : vector<1x128xf32>
    %15 = tpu.matmul %14, %13, %cst_15 {dimension_numbers = #tpu.dot_dimension_numbers<[1], [0], [0], [1], [0, 0, 1, 1], [], []>} : vector<1x16xf32>, vector<16x128xf32>, vector<1x128xf32> -> vector<1x128xf32>
    %c0_16 = arith.constant 0 : index
    %c0_17 = arith.constant 0 : index
    %16 = vector.load %arg8[%c0_16, %c0_17] : memref<1x1xf32, #tpu.memory_space<vmem>>, vector<1x1xf32>
    %17 = vector.broadcast %16 : vector<1x1xf32> to vector<1x128xf32>
    %18 = arith.addf %15, %17 : vector<1x128xf32>
    %cst_18 = arith.constant 0.000000e+00 : f32
    %19 = vector.broadcast %cst_18 : f32 to vector<1x128xf32>
    %20 = arith.subf %19, %18 : vector<1x128xf32>
    %21 = math.exp %20 : vector<1x128xf32>
    %cst_19 = arith.constant 1.000000e+00 : f32
    %22 = vector.broadcast %cst_19 : f32 to vector<1x128xf32>
    %23 = arith.addf %22, %21 : vector<1x128xf32>
    %cst_20 = arith.constant 1.000000e+00 : f32
    %24 = vector.broadcast %cst_20 : f32 to vector<1x128xf32>
    %25 = arith.divf %24, %23 : vector<1x128xf32>
    %c0_21 = arith.constant 0 : index
    %c0_22 = arith.constant 0 : index
    %c0_23 = arith.constant 0 : index
    %26 = vector.load %arg9[%c0_21, %c0_22, %c0_23] : memref<1x1x128xf32, #tpu.memory_space<vmem>>, vector<1x1x128xf32>
    %27 = vector.shape_cast %26 : vector<1x1x128xf32> to vector<1x128xf32>
    %28 = vector.shape_cast %25 : vector<1x128xf32> to vector<1x1x128xf32>
    tpu.vector_store %arg9[%c0_21, %c0_22, %c0_23], %28 {strides = array<i32>} : memref<1x1x128xf32, #tpu.memory_space<vmem>>, vector<1x1x128xf32>,
    return
  }
  func.func @transform_0(%arg0: i32, %arg1: i32) -> (i32, i32, i32) {
    %c0_i32 = arith.constant 0 : i32
    %c0_i32_0 = arith.constant 0 : i32
    return %arg0, %c0_i32, %arg1 : i32, i32, i32
  }
  func.func @transform_1(%arg0: i32, %arg1: i32) -> (i32, i32, i32) {
    %c0_i32 = arith.constant 0 : i32
    %c0_i32_0 = arith.constant 0 : i32
    return %arg0, %c0_i32, %arg1 : i32, i32, i32
  }
  func.func @transform_2(%arg0: i32, %arg1: i32) -> (i32, i32) {
    %c0_i32 = arith.constant 0 : i32
    %c0_i32_0 = arith.constant 0 : i32
    %c0_i32_1 = arith.constant 0 : i32
    return %c0_i32, %c0_i32_0 : i32, i32
  }
  func.func @transform_3(%arg0: i32, %arg1: i32) -> (i32, i32) {
    %c0_i32 = arith.constant 0 : i32
    %c0_i32_0 = arith.constant 0 : i32
    %c0_i32_1 = arith.constant 0 : i32
    return %c0_i32, %c0_i32_0 : i32, i32
  }
  func.func @transform_4(%arg0: i32, %arg1: i32) -> (i32, i32) {
    %c0_i32 = arith.constant 0 : i32
    %c0_i32_0 = arith.constant 0 : i32
    %c0_i32_1 = arith.constant 0 : i32
    return %c0_i32, %c0_i32_0 : i32, i32
  }
  func.func @transform_5(%arg0: i32, %arg1: i32) -> (i32, i32) {
    %c0_i32 = arith.constant 0 : i32
    %c0_i32_0 = arith.constant 0 : i32
    %c0_i32_1 = arith.constant 0 : i32
    return %c0_i32, %c0_i32_0 : i32, i32
  }
  func.func @transform_6(%arg0: i32, %arg1: i32) -> (i32, i32) {
    %c0_i32 = arith.constant 0 : i32
    %c0_i32_0 = arith.constant 0 : i32
    %c0_i32_1 = arith.constant 0 : i32
    return %c0_i32, %c0_i32_0 : i32, i32
  }
  func.func @transform_7(%arg0: i32, %arg1: i32) -> (i32, i32, i32) {
    %c0_i32 = arith.constant 0 : i32
    %c0_i32_0 = arith.constant 0 : i32
    return %arg0, %c0_i32, %arg1 : i32, i32, i32
  }
}

module attributes {stable_mosaic.version = 11 : i64} {
  func.func @_att_upsample_kernel(%arg0: i32, %arg1: memref<1x8x64xf32, #tpu.memory_space<vmem>>, %arg2: memref<64x256xf32, #tpu.memory_space<vmem>>, %arg3: memref<16x8xf32, #tpu.memory_space<vmem>>, %arg4: memref<1x16x256xf32, #tpu.memory_space<vmem>>) attributes {dimension_semantics = [#tpu.dimension_semantics<parallel>], iteration_bounds = array<i64: 2>, scalar_prefetch = 0 : i64, scratch_operands = 0 : i64, tpu.core_type = #tpu.core_type<tc>, window_params = [{transform_indices = @transform_0, window_bounds = array<i64: 1, 8, 64>}, {pipeline_mode = #tpu.pipeline_mode<synchronous>, transform_indices = @transform_1, window_bounds = array<i64: 64, 256>}, {pipeline_mode = #tpu.pipeline_mode<synchronous>, transform_indices = @transform_2, window_bounds = array<i64: 16, 8>}, {transform_indices = @transform_3, window_bounds = array<i64: 1, 16, 256>}]} {
    %c0 = arith.constant 0 : index
    %c0_0 = arith.constant 0 : index
    %c0_1 = arith.constant 0 : index
    %0 = vector.load %arg1[%c0, %c0_0, %c0_1] : memref<1x8x64xf32, #tpu.memory_space<vmem>>, vector<1x8x64xf32>
    %1 = vector.shape_cast %0 : vector<1x8x64xf32> to vector<8x64xf32>
    %c0_2 = arith.constant 0 : index
    %c0_3 = arith.constant 0 : index
    %2 = vector.load %arg2[%c0_2, %c0_3] : memref<64x256xf32, #tpu.memory_space<vmem>>, vector<64x256xf32>
    %cst = arith.constant dense<0.000000e+00> : vector<8x256xf32>
    %3 = tpu.matmul %1, %2, %cst {dimension_numbers = #tpu.dot_dimension_numbers<[1], [0], [0], [1], [0, 0, 1, 1], [], []>} : vector<8x64xf32>, vector<64x256xf32>, vector<8x256xf32> -> vector<8x256xf32>
    %c0_4 = arith.constant 0 : index
    %c0_5 = arith.constant 0 : index
    %4 = vector.load %arg3[%c0_4, %c0_5] : memref<16x8xf32, #tpu.memory_space<vmem>>, vector<16x8xf32>
    %cst_6 = arith.constant dense<0.000000e+00> : vector<16x256xf32>
    %5 = tpu.matmul %4, %3, %cst_6 {dimension_numbers = #tpu.dot_dimension_numbers<[1], [0], [0], [1], [0, 0, 1, 1], [], []>} : vector<16x8xf32>, vector<8x256xf32>, vector<16x256xf32> -> vector<16x256xf32>
    %c0_7 = arith.constant 0 : index
    %c0_8 = arith.constant 0 : index
    %c0_9 = arith.constant 0 : index
    %6 = vector.load %arg4[%c0_7, %c0_8, %c0_9] : memref<1x16x256xf32, #tpu.memory_space<vmem>>, vector<1x16x256xf32>
    %7 = vector.shape_cast %6 : vector<1x16x256xf32> to vector<16x256xf32>
    %8 = vector.shape_cast %5 : vector<16x256xf32> to vector<1x16x256xf32>
    tpu.vector_store %arg4[%c0_7, %c0_8, %c0_9], %8 {strides = array<i32>} : memref<1x16x256xf32, #tpu.memory_space<vmem>>, vector<1x16x256xf32>,
    return
  }
  func.func @transform_0(%arg0: i32) -> (i32, i32, i32) {
    %c0_i32 = arith.constant 0 : i32
    %c0_i32_0 = arith.constant 0 : i32
    %c0_i32_1 = arith.constant 0 : i32
    return %arg0, %c0_i32, %c0_i32_0 : i32, i32, i32
  }
  func.func @transform_1(%arg0: i32) -> (i32, i32) {
    %c0_i32 = arith.constant 0 : i32
    %c0_i32_0 = arith.constant 0 : i32
    %c0_i32_1 = arith.constant 0 : i32
    return %c0_i32, %c0_i32_0 : i32, i32
  }
  func.func @transform_2(%arg0: i32) -> (i32, i32) {
    %c0_i32 = arith.constant 0 : i32
    %c0_i32_0 = arith.constant 0 : i32
    %c0_i32_1 = arith.constant 0 : i32
    return %c0_i32, %c0_i32_0 : i32, i32
  }
  func.func @transform_3(%arg0: i32) -> (i32, i32, i32) {
    %c0_i32 = arith.constant 0 : i32
    %c0_i32_0 = arith.constant 0 : i32
    %c0_i32_1 = arith.constant 0 : i32
    return %arg0, %c0_i32, %c0_i32_0 : i32, i32, i32
  }
}

module attributes {stable_mosaic.version = 11 : i64} {
  func.func @_gate_wconv_stats_kernel(%arg0: i32, %arg1: i32, %arg2: memref<1x32x1024xf32, #tpu.memory_space<vmem>>, %arg3: memref<1x1x1024xf32, #tpu.memory_space<vmem>>, %arg4: memref<32x32xf32, #tpu.memory_space<vmem>>, %arg5: memref<32x1xf32, #tpu.memory_space<vmem>>, %arg6: memref<1x32x1xf32, #tpu.memory_space<vmem>>, %arg7: memref<1x32x1xf32, #tpu.memory_space<vmem>>) attributes {dimension_semantics = [#tpu.dimension_semantics<parallel>, #tpu.dimension_semantics<parallel>], iteration_bounds = array<i64: 2, 4>, scalar_prefetch = 0 : i64, scratch_operands = 0 : i64, tpu.core_type = #tpu.core_type<tc>, window_params = [{transform_indices = @transform_0, window_bounds = array<i64: 1, 32, 1024>}, {transform_indices = @transform_1, window_bounds = array<i64: 1, 1, 1024>}, {pipeline_mode = #tpu.pipeline_mode<synchronous>, transform_indices = @transform_2, window_bounds = array<i64: 32, 32>}, {pipeline_mode = #tpu.pipeline_mode<synchronous>, transform_indices = @transform_3, window_bounds = array<i64: 32, 1>}, {transform_indices = @transform_4, window_bounds = array<i64: 1, 32, 1>}, {transform_indices = @transform_5, window_bounds = array<i64: 1, 32, 1>}]} {
    %c0 = arith.constant 0 : index
    %c0_0 = arith.constant 0 : index
    %0 = vector.load %arg4[%c0, %c0_0] : memref<32x32xf32, #tpu.memory_space<vmem>>, vector<32x32xf32>
    %c0_1 = arith.constant 0 : index
    %c0_2 = arith.constant 0 : index
    %c0_3 = arith.constant 0 : index
    %1 = vector.load %arg2[%c0_1, %c0_2, %c0_3] : memref<1x32x1024xf32, #tpu.memory_space<vmem>>, vector<1x32x1024xf32>
    %2 = vector.shape_cast %1 : vector<1x32x1024xf32> to vector<32x1024xf32>
    %cst = arith.constant dense<0.000000e+00> : vector<32x1024xf32>
    %3 = tpu.matmul %0, %2, %cst {dimension_numbers = #tpu.dot_dimension_numbers<[1], [0], [0], [1], [0, 0, 1, 1], [], []>} : vector<32x32xf32>, vector<32x1024xf32>, vector<32x1024xf32> -> vector<32x1024xf32>
    %c0_4 = arith.constant 0 : index
    %c0_5 = arith.constant 0 : index
    %c0_6 = arith.constant 0 : index
    %4 = vector.load %arg3[%c0_4, %c0_5, %c0_6] : memref<1x1x1024xf32, #tpu.memory_space<vmem>>, vector<1x1x1024xf32>
    %5 = vector.shape_cast %4 : vector<1x1x1024xf32> to vector<1x1024xf32>
    %6 = vector.broadcast %5 : vector<1x1024xf32> to vector<32x1024xf32>
    %7 = arith.mulf %3, %6 : vector<32x1024xf32>
    %c0_7 = arith.constant 0 : index
    %c0_8 = arith.constant 0 : index
    %8 = vector.load %arg5[%c0_7, %c0_8] : memref<32x1xf32, #tpu.memory_space<vmem>>, vector<32x1xf32>
    %9 = vector.broadcast %8 : vector<32x1xf32> to vector<32x1024xf32>
    %10 = arith.addf %7, %9 : vector<32x1024xf32>
    %cst_9 = arith.constant dense<0.000000e+00> : vector<32xf32>
    %11 = vector.multi_reduction <add>, %10, %cst_9 [1] : vector<32x1024xf32> to vector<32xf32>
    %12 = vector.shape_cast %11 : vector<32xf32> to vector<32x1xf32>
    %c0_10 = arith.constant 0 : index
    %c0_11 = arith.constant 0 : index
    %c0_12 = arith.constant 0 : index
    %13 = vector.load %arg6[%c0_10, %c0_11, %c0_12] : memref<1x32x1xf32, #tpu.memory_space<vmem>>, vector<1x32x1xf32>
    %14 = vector.shape_cast %13 : vector<1x32x1xf32> to vector<32x1xf32>
    %15 = vector.shape_cast %12 : vector<32x1xf32> to vector<1x32x1xf32>
    tpu.vector_store %arg6[%c0_10, %c0_11, %c0_12], %15 {strides = array<i32>} : memref<1x32x1xf32, #tpu.memory_space<vmem>>, vector<1x32x1xf32>,
    %16 = arith.mulf %10, %10 : vector<32x1024xf32>
    %cst_13 = arith.constant dense<0.000000e+00> : vector<32xf32>
    %17 = vector.multi_reduction <add>, %16, %cst_13 [1] : vector<32x1024xf32> to vector<32xf32>
    %18 = vector.shape_cast %17 : vector<32xf32> to vector<32x1xf32>
    %c0_14 = arith.constant 0 : index
    %c0_15 = arith.constant 0 : index
    %c0_16 = arith.constant 0 : index
    %19 = vector.load %arg7[%c0_14, %c0_15, %c0_16] : memref<1x32x1xf32, #tpu.memory_space<vmem>>, vector<1x32x1xf32>
    %20 = vector.shape_cast %19 : vector<1x32x1xf32> to vector<32x1xf32>
    %21 = vector.shape_cast %18 : vector<32x1xf32> to vector<1x32x1xf32>
    tpu.vector_store %arg7[%c0_14, %c0_15, %c0_16], %21 {strides = array<i32>} : memref<1x32x1xf32, #tpu.memory_space<vmem>>, vector<1x32x1xf32>,
    return
  }
  func.func @transform_0(%arg0: i32, %arg1: i32) -> (i32, i32, i32) {
    %c0_i32 = arith.constant 0 : i32
    %c0_i32_0 = arith.constant 0 : i32
    return %arg0, %c0_i32, %arg1 : i32, i32, i32
  }
  func.func @transform_1(%arg0: i32, %arg1: i32) -> (i32, i32, i32) {
    %c0_i32 = arith.constant 0 : i32
    %c0_i32_0 = arith.constant 0 : i32
    return %arg0, %c0_i32, %arg1 : i32, i32, i32
  }
  func.func @transform_2(%arg0: i32, %arg1: i32) -> (i32, i32) {
    %c0_i32 = arith.constant 0 : i32
    %c0_i32_0 = arith.constant 0 : i32
    %c0_i32_1 = arith.constant 0 : i32
    return %c0_i32, %c0_i32_0 : i32, i32
  }
  func.func @transform_3(%arg0: i32, %arg1: i32) -> (i32, i32) {
    %c0_i32 = arith.constant 0 : i32
    %c0_i32_0 = arith.constant 0 : i32
    %c0_i32_1 = arith.constant 0 : i32
    return %c0_i32, %c0_i32_0 : i32, i32
  }
  func.func @transform_4(%arg0: i32, %arg1: i32) -> (i32, i32, i32) {
    %c4_i32 = arith.constant 4 : i32
    %0 = arith.muli %arg0, %c4_i32 : i32
    %1 = arith.addi %0, %arg1 : i32
    %c0_i32 = arith.constant 0 : i32
    %c0_i32_0 = arith.constant 0 : i32
    %c0_i32_1 = arith.constant 0 : i32
    return %1, %c0_i32, %c0_i32_0 : i32, i32, i32
  }
  func.func @transform_5(%arg0: i32, %arg1: i32) -> (i32, i32, i32) {
    %c4_i32 = arith.constant 4 : i32
    %0 = arith.muli %arg0, %c4_i32 : i32
    %1 = arith.addi %0, %arg1 : i32
    %c0_i32 = arith.constant 0 : i32
    %c0_i32_0 = arith.constant 0 : i32
    %c0_i32_1 = arith.constant 0 : i32
    return %1, %c0_i32, %c0_i32_0 : i32, i32, i32
  }
}

module attributes {stable_mosaic.version = 11 : i64} {
  func.func @_gate_wconv_apply_kernel(%arg0: i32, %arg1: i32, %arg2: memref<1x32x1024xf32, #tpu.memory_space<vmem>>, %arg3: memref<1x1x1024xf32, #tpu.memory_space<vmem>>, %arg4: memref<32x32xf32, #tpu.memory_space<vmem>>, %arg5: memref<32x1xf32, #tpu.memory_space<vmem>>, %arg6: memref<1x32x1024xf32, #tpu.memory_space<vmem>>) attributes {dimension_semantics = [#tpu.dimension_semantics<parallel>, #tpu.dimension_semantics<parallel>], iteration_bounds = array<i64: 2, 4>, scalar_prefetch = 0 : i64, scratch_operands = 0 : i64, tpu.core_type = #tpu.core_type<tc>, window_params = [{transform_indices = @transform_0, window_bounds = array<i64: 1, 32, 1024>}, {transform_indices = @transform_1, window_bounds = array<i64: 1, 1, 1024>}, {pipeline_mode = #tpu.pipeline_mode<synchronous>, transform_indices = @transform_2, window_bounds = array<i64: 32, 32>}, {pipeline_mode = #tpu.pipeline_mode<synchronous>, transform_indices = @transform_3, window_bounds = array<i64: 32, 1>}, {transform_indices = @transform_4, window_bounds = array<i64: 1, 32, 1024>}]} {
    %c0 = arith.constant 0 : index
    %c0_0 = arith.constant 0 : index
    %0 = vector.load %arg4[%c0, %c0_0] : memref<32x32xf32, #tpu.memory_space<vmem>>, vector<32x32xf32>
    %c0_1 = arith.constant 0 : index
    %c0_2 = arith.constant 0 : index
    %c0_3 = arith.constant 0 : index
    %1 = vector.load %arg2[%c0_1, %c0_2, %c0_3] : memref<1x32x1024xf32, #tpu.memory_space<vmem>>, vector<1x32x1024xf32>
    %2 = vector.shape_cast %1 : vector<1x32x1024xf32> to vector<32x1024xf32>
    %cst = arith.constant dense<0.000000e+00> : vector<32x1024xf32>
    %3 = tpu.matmul %0, %2, %cst {dimension_numbers = #tpu.dot_dimension_numbers<[1], [0], [0], [1], [0, 0, 1, 1], [], []>} : vector<32x32xf32>, vector<32x1024xf32>, vector<32x1024xf32> -> vector<32x1024xf32>
    %c0_4 = arith.constant 0 : index
    %c0_5 = arith.constant 0 : index
    %c0_6 = arith.constant 0 : index
    %4 = vector.load %arg3[%c0_4, %c0_5, %c0_6] : memref<1x1x1024xf32, #tpu.memory_space<vmem>>, vector<1x1x1024xf32>
    %5 = vector.shape_cast %4 : vector<1x1x1024xf32> to vector<1x1024xf32>
    %6 = vector.broadcast %5 : vector<1x1024xf32> to vector<32x1024xf32>
    %7 = arith.mulf %3, %6 : vector<32x1024xf32>
    %c0_7 = arith.constant 0 : index
    %c0_8 = arith.constant 0 : index
    %8 = vector.load %arg5[%c0_7, %c0_8] : memref<32x1xf32, #tpu.memory_space<vmem>>, vector<32x1xf32>
    %9 = vector.broadcast %8 : vector<32x1xf32> to vector<32x1024xf32>
    %10 = arith.addf %7, %9 : vector<32x1024xf32>
    %c0_9 = arith.constant 0 : index
    %c0_10 = arith.constant 0 : index
    %c0_11 = arith.constant 0 : index
    %11 = vector.load %arg6[%c0_9, %c0_10, %c0_11] : memref<1x32x1024xf32, #tpu.memory_space<vmem>>, vector<1x32x1024xf32>
    %12 = vector.shape_cast %11 : vector<1x32x1024xf32> to vector<32x1024xf32>
    %13 = vector.shape_cast %10 : vector<32x1024xf32> to vector<1x32x1024xf32>
    tpu.vector_store %arg6[%c0_9, %c0_10, %c0_11], %13 {strides = array<i32>} : memref<1x32x1024xf32, #tpu.memory_space<vmem>>, vector<1x32x1024xf32>,
    return
  }
  func.func @transform_0(%arg0: i32, %arg1: i32) -> (i32, i32, i32) {
    %c0_i32 = arith.constant 0 : i32
    %c0_i32_0 = arith.constant 0 : i32
    return %arg0, %c0_i32, %arg1 : i32, i32, i32
  }
  func.func @transform_1(%arg0: i32, %arg1: i32) -> (i32, i32, i32) {
    %c0_i32 = arith.constant 0 : i32
    %c0_i32_0 = arith.constant 0 : i32
    return %arg0, %c0_i32, %arg1 : i32, i32, i32
  }
  func.func @transform_2(%arg0: i32, %arg1: i32) -> (i32, i32) {
    %c0_i32 = arith.constant 0 : i32
    %c0_i32_0 = arith.constant 0 : i32
    %c0_i32_1 = arith.constant 0 : i32
    return %c0_i32, %c0_i32_0 : i32, i32
  }
  func.func @transform_3(%arg0: i32, %arg1: i32) -> (i32, i32) {
    %c0_i32 = arith.constant 0 : i32
    %c0_i32_0 = arith.constant 0 : i32
    %c0_i32_1 = arith.constant 0 : i32
    return %c0_i32, %c0_i32_0 : i32, i32
  }
  func.func @transform_4(%arg0: i32, %arg1: i32) -> (i32, i32, i32) {
    %c0_i32 = arith.constant 0 : i32
    %c0_i32_0 = arith.constant 0 : i32
    return %arg0, %c0_i32, %arg1 : i32, i32, i32
  }
}

</mosaic_0001>

<bundles_post_ra>
// kernel: grid_attention_block_3d.5
= control target key start
LH: loop header
LB: loop body
LE: loop exit
PB: predicated region body
PF: predicated region fallthrough
CT: control target
= control target key end

     0   :  { %s473_s12 = smov 0   ;;  %s548_s0 = inlined_call_operand.vmem [shape: f32[2,8,64], index: 0, kind: input, shape index: {}]   ;;  %s549_s1 = inlined_call_operand.vmem [shape: f32[64,256], index: 1, kind: input, shape index: {}]   ;;  %s550_s2 = inlined_call_operand.vmem [shape: f32[16,8], index: 2, kind: input, shape index: {}]   ;;  %s551_s3 = inlined_call_operand.vmem [shape: f32[2,16,256], index: 3, kind: output, shape index: {}]  }
   0x1 LB: > { %s405_s13 = sadd.s32 4294967295, %s450_s12   ;;  %p409_p0 = scmp.ge.s32.totalorder %s450_s12, 1  ;;  %s450_s12 = sphi %s473_s12, %s13_s12  }
   0x2   : > { %p136_p1 = scmp.lt.s32.totalorder %s450_s12, 3 }
   0x4   : > { %p137_p2 = pnand %p409_p0, %p136_p1 }
   0x5   : > { %v170_v0 = vld [vmem:[%s549_s1 + $0x8] sm:$0xff] (!%p137_p2)  ;;  %v172_v1 = vld [vmem:[%s549_s1 + $0x18] sm:$0xff] (!%p137_p2)  ;;  %v169_v2 = vld [vmem:[%s549_s1] sm:$0xff] (!%p137_p2)  ;;  %v452_v7 = vmov (!%p137_p2), 0.0   ;;  %p159_p3 = scmp.lt.s32.totalorder (!%p137_p2), %s405_s13, 1  ;;  %vm185_vm0 = vcmask (!%p137_p2), 523264  }
   0x6   : > { %140 = sbr.rel (%p137_p2) target bundleno = 457 (0x1c9), region = 32  ;;  %v419_v3 = vpack.c.bf16 (!%p137_p2), %v172_v1, %v170_v0  ;;  %v171_v4 = vld [vmem:[%s549_s1 + $0x10] sm:$0xff] (!%p137_p2)  ;;  %v174_v5 = vld [vmem:[%s549_s1 + $0x28] sm:$0xff] (!%p137_p2)  ;;  %v176_v6 = vld [vmem:[%s549_s1 + $0x38] sm:$0xff] (!%p137_p2)  ;;  %253 = vmatprep.mubr.f32.mxu0 (!%p137_p2), %v452_v7  ;;  %333 = vmatprep.mubr.f32.mxu1 (!%p137_p2), %v452_v7  ;;  %vm262_vm1 = vcmask (!%p137_p2), 64512  }
   0x7   : > { %v421_v8 = vpack.c.bf16 (!%p137_p2), %v171_v4, %v169_v2  ;;  %v423_v9 = vpack.c.bf16 (!%p137_p2), %v176_v6, %v174_v5  ;;  %v173_v10 = vld [vmem:[%s549_s1 + $0x20] sm:$0xff] (!%p137_p2)  ;;  %v175_v11 = vld [vmem:[%s549_s1 + $0x30] sm:$0xff] (!%p137_p2)  ;;  %v178_v12 = vld [vmem:[%s549_s1 + $0x48] sm:$0xff] (!%p137_p2) }
   0x8   : > { %420 = vmatprep.subr.bf16.mxu0 (!%p137_p2), %v419_v3  ;;  %v180_v13 = vld [vmem:[%s549_s1 + $0x58] sm:$0xff] (!%p137_p2)  ;;  %v425_v14 = vpack.c.bf16 (!%p137_p2), %v175_v11, %v173_v10  ;;  %v177_v16 = vld [vmem:[%s549_s1 + $0x40] sm:$0xff] (!%p137_p2)  ;;  %v179_v17 = vld [vmem:[%s549_s1 + $0x50] sm:$0xff] (!%p137_p2) }
   0x9   : > { %422 = vmatpush1.bf16.msra.mxu0 (!%p137_p2), %v421_v8  ;;  %v427_v15 = vpack.c.bf16 (!%p137_p2), %v180_v13, %v178_v12  ;;  %v182_v18 = vld [vmem:[%s549_s1 + $0x68] sm:$0xff] (!%p137_p2)  ;;  %v184_v19 = vld [vmem:[%s549_s1 + $0x78] sm:$0xff] (!%p137_p2)  ;;  %v429_v20 = vpack.c.bf16 (!%p137_p2), %v179_v17, %v177_v16  ;;  %v181_v22 = vld [vmem:[%s549_s1 + $0x60] sm:$0xff] (!%p137_p2) }
   0xa   : > { %424 = vmatprep.subr.bf16.mxu0 (!%p137_p2), %v423_v9  ;;  %v431_v21 = vpack.c.bf16 (!%p137_p2), %v184_v19, %v182_v18  ;;  %v183_v23 = vld [vmem:[%s549_s1 + $0x70] sm:$0xff] (!%p137_p2)  ;;  %v260_v28 = vld [vmem:[%s550_s2] sm:$0xff] (!%p137_p2)  ;;  %v261_v29 = vld [vmem:[%s550_s2 + $0x8] sm:$0xff] (!%p137_p2) }
   0xb   : > { %v433_v24 = vpack.c.bf16 (!%p137_p2), %v183_v23, %v181_v22 }
   0xd   : > { %s553_s13 = smov (!%p159_p3, %s405_s13), 1  ;;  %426 = vmatpush1.bf16.msra.mxu0 %v425_v14 }
   0xe   : > { %428 = vmatprep.subr.bf16.mxu0 %v427_v15  ;;  %s410_s21 = sshll.u32 %s553_s13, 3  ;;  %s418_s29 = sshll.u32 %s553_s13, 5 }
   0xf   : > { %s162_s24 = scalar_lea.vmem %s548_s0, %s410_s21  ;;  %s167_s5 = scalar_lea.vmem %s551_s3, %s418_s29 }
  0x10   : > { %v168_v25 = vld [vmem:[%s162_s24] sm:$0xff] }
  0x11   : > { %430 = vmatpush1.bf16.msra.mxu0 %v429_v20 }
  0x12   : > { %432 = vmatprep.subr.bf16.mxu0 %v431_v21 }
  0x15   : > { %434 = vmatpush1.bf16.msra.mxu0 %v433_v24 }
  0x18   : > { %413 = vmatmul.mubr.msk.f32.vlgmr.msra.gmra.mrb[0].mxu0 %vm185_vm0, %v168_v25 }
  0xeb   : > { %v255_v26 = vpop.f32.mrb[0].mxu0 }
  0xec   : > { %v257_v27 = vpop.f32.mrb[1].mxu0 }
  0xed   : > { %269 = vmatprep.subr.mxu1 %v257_v27 }
  0xee   : > { %270 = vmatpush1.msra.mxu1 %v255_v26 }
  0xef   : > { %414 = vmatmul.mubr.msk.f32.vlgmr.msra.gmra.mrb[0].mxu1 %vm262_vm1, %v260_v28 }
  0xf0   : > { %339 = vmatprep.mubr.f32.mxu1 %v452_v7 }
  0xf3   : > { %415 = vmatmul.mubr.msk.f32.gmra.mrb[2].mxu1 %vm262_vm1, %v261_v29 }
 0x1c2   : > { %v335_v30 = vpop.f32.mrb[0].mxu1 }
 0x1c3   : > { %346 = vst [vmem:[%s167_s5] sm:$0xff] %v335_v30  ;;  %v337_v31 = vpop.f32.mrb[1].mxu1 }
 0x1c4   : > { %347 = vst [vmem:[%s167_s5 + $0x8] sm:$0xff] %v337_v31 }
 0x1c6   : > { %v341_v32 = vpop.f32.mrb[2].mxu1 }
 0x1c7   : > { %348 = vst [vmem:[%s167_s5 + $0x10] sm:$0xff] %v341_v32  ;;  %v343_v33 = vpop.f32.mrb[3].mxu1 }
 0x1c8   : > { %349 = vst [vmem:[%s167_s5 + $0x18] sm:$0xff] %v343_v33 }
 0x1c9 PF: > { %s13_s12 = sadd.s32 1, %s450_s12  }
 0x1ca   : > { %p10_p4 = scmp.ge.s32.totalorder %s13_s12, 4  }
 0x1cc   :  { %12 = sbr.rel (!%p10_p4) target bundleno = 1 (0x1), region = 62 }

// kernel: grid_attention_block_3d.4
= control target key start
LH: loop header
LB: loop body
LE: loop exit
PB: predicated region body
PF: predicated region fallthrough
CT: control target
= control target key end

     0   :  { %s1470_s0 = inlined_call_operand.vmem [shape: f32[2,256,512], index: 0, kind: input, shape index: {}]   ;;  %s1471_s1 = inlined_call_operand.vmem [shape: f32[2,32,512], index: 1, kind: input, shape index: {}]   ;;  %s1472_s2 = inlined_call_operand.vmem [shape: f32[16,256], index: 2, kind: input, shape index: {}]   ;;  %s1473_s3 = inlined_call_operand.vmem [shape: f32[16,32], index: 3, kind: input, shape index: {}]   ;;  %s1474_s4 = inlined_call_operand.vmem [shape: f32[16,1], index: 4, kind: input, shape index: {}]   ;;  %s1475_s5 = inlined_call_operand.vmem [shape: f32[1,16], index: 5, kind: input, shape index: {}]   ;;  %s1476_s6 = inlined_call_operand.<no memory space> [shape: f32[1,1], index: 6, kind: input, shape index: {}]   ;;  %s1477_s7 = inlined_call_operand.vmem [shape: f32[2,1,512], index: 7, kind: output, shape index: {}]  }
   0x1   :  { %v12_v0 = vstv %s1476_s6 }
   0x2   :  { %13 = vst [vmem:[#allocation2] sm:$0x1] %v12_v0 }
   0x3   :  { %s1234_s26 = smov 0   ;;  %s1236_s27 = smov 0  }
   0x4   :  { %s1238_s28 = smov 0   ;;  %s1240_s29 = smov 0  }
   0x5   :  { %s1242_s30 = smov 0   ;;  %s1244_s8 = smov 0  }
   0x6   :  { %s1246_s9 = smov 0  }
   0x7 LB: > { %s28_s6 = sadd.s32 1, %s1177_s30  ;;  %s31_s10 = sadd.s32 1, %s1181_s8  ;;  %s1185_s9 = sphi %s1246_s9, %s19_s9   ;;  %s1181_s8 = sphi %s1244_s8, %s1484_s8   ;;  %s1177_s30 = sphi %s1242_s30, %s1483_s30   ;;  %s1173_s29 = sphi %s1240_s29, %s1482_s29   ;;  %s1169_s28 = sphi %s1238_s28, %s1481_s28   ;;  %s1165_s27 = sphi %s1236_s27, %s1480_s27   ;;  %s1161_s26 = sphi %s1234_s26, %s1479_s26  }
   0x8   : > { %p29_p0 = scmp.ge.s32.totalorder %s28_s6, 4  ;;  %p47_p1 = scmp.ne.s32.totalorder %s1165_s27, %s1161_s26 }
   0x9   : > { %p48_p2 = scmp.eq.s32.totalorder %s1185_s9, 0  ;;  %s40_s15 = sadd.s32 1, %s1165_s27 }
   0xa   : > { %s1486_s6 = smov (%p29_p0, %s28_s6), 0  ;;  %s1488_s10 = smov (!%p29_p0, %s31_s10), %s1181_s8 }
   0xb   : > { %p1277_p3 = por %p48_p2, %p47_p1  ;;  %p33_p4 = scmp.ge.s32.totalorder %s1488_s10, 2 }
   0xc   : > { %s36_s12 = ssub.s32 %s1177_s30, %s1486_s6  ;;  %p941_p6 = scmp.ge.s32.totalorder %s1185_s9, 8 }
   0xd   : > { %s1490_s10 = smov (%p33_p4, %s1488_s10), 0 }
   0xe   : > { %s35_s13 = ssub.s32 %s1181_s8, %s1490_s10  ;;  %249 = sbr.rel (%p941_p6) target bundleno = 69 (0x45), region = 36 }
   0xf   : > { %s37_s14 = sor.u32 %s36_s12, %s35_s13 }
  0x10   : > { %p38_p5 = scmp.eq.s32.totalorder %s37_s14, 0 }
  0x12   : > { %s1289_s16 = scalar_select %p38_p5, %s1165_s27, %s40_s15  }
  0x15   : > { %252 = sbr.rel (!%p1277_p3) target bundleno = 59 (0x3b), region = 40  ;;  %s254_s17 = sand.u32 (%p1277_p3), 1, %s1165_s27  }
  0x16   : > { %s943_s18 = sshll.u32 (%p1277_p3), %s1181_s8, 7  ;;  %s942_s19 = sshll.u32 (%p1277_p3), %s254_s17, 8 }
  0x17   : > { %s258_s20 = sadd.s32 (%p1277_p3), %s1177_s30, %s943_s18  ;;  %s1305_s25 = scalar_lea.vmem (%p1277_p3), [#allocation3], %s942_s19 }
  0x18   : > { %s944_s21 = sshll.u32 (%p1277_p3), %s258_s20, 3 }
  0x19   : > { %s1300_s24 = scalar_lea.vmem (%p1277_p3), %s1470_s0, %s944_s21 }
  0x1a   : > { %v350_v1 = vld [vmem:[%s1300_s24] sm:$0xff] (%p1277_p3) }
  0x1b   : > { %v352_v2 = vld [vmem:[%s1300_s24 + $0x20] sm:$0xff] (%p1277_p3)  ;;  %351 = vst [vmem:[%s1305_s25] sm:$0xff] (%p1277_p3), %v350_v1 }
  0x1c   : > { %v354_v3 = vld [vmem:[%s1300_s24 + $0x40] sm:$0xff]  ;;  %353 = vst [vmem:[%s1305_s25 + $0x8] sm:$0xff] %v352_v2 }
  0x1d   : > { %355 = vst [vmem:[%s1305_s25 + $0x10] sm:$0xff] %v354_v3  ;;  %v356_v4 = vld [vmem:[%s1300_s24 + $0x60] sm:$0xff] }
  0x1e   : > { %v358_v5 = vld [vmem:[%s1300_s24 + $0x80] sm:$0xff]  ;;  %357 = vst [vmem:[%s1305_s25 + $0x18] sm:$0xff] %v356_v4 }
  0x1f   : > { %v360_v6 = vld [vmem:[%s1300_s24 + $0xa0] sm:$0xff]  ;;  %359 = vst [vmem:[%s1305_s25 + $0x20] sm:$0xff] %v358_v5 }
  0x20   : > { %361 = vst [vmem:[%s1305_s25 + $0x28] sm:$0xff] %v360_v6  ;;  %v362_v7 = vld [vmem:[%s1300_s24 + $0xc0] sm:$0xff] }
  0x21   : > { %v364_v8 = vld [vmem:[%s1300_s24 + $0xe0] sm:$0xff]  ;;  %363 = vst [vmem:[%s1305_s25 + $0x30] sm:$0xff] %v362_v7 }
  0x22   : > { %v366_v9 = vld [vmem:[%s1300_s24 + $0x100] sm:$0xff]  ;;  %365 = vst [vmem:[%s1305_s25 + $0x38] sm:$0xff] %v364_v8 }
  0x23   : > { %367 = vst [vmem:[%s1305_s25 + $0x40] sm:$0xff] %v366_v9  ;;  %v368_v10 = vld [vmem:[%s1300_s24 + $0x120] sm:$0xff] }
  0x24   : > { %v370_v11 = vld [vmem:[%s1300_s24 + $0x140] sm:$0xff]  ;;  %369 = vst [vmem:[%s1305_s25 + $0x48] sm:$0xff] %v368_v10 }
  0x25   : > { %v372_v12 = vld [vmem:[%s1300_s24 + $0x160] sm:$0xff]  ;;  %371 = vst [vmem:[%s1305_s25 + $0x50] sm:$0xff] %v370_v11 }
  0x26   : > { %373 = vst [vmem:[%s1305_s25 + $0x58] sm:$0xff] %v372_v12  ;;  %v374_v13 = vld [vmem:[%s1300_s24 + $0x180] sm:$0xff] }
  0x27   : > { %v376_v14 = vld [vmem:[%s1300_s24 + $0x1a0] sm:$0xff]  ;;  %375 = vst [vmem:[%s1305_s25 + $0x60] sm:$0xff] %v374_v13 }
  0x28   : > { %v378_v15 = vld [vmem:[%s1300_s24 + $0x1c0] sm:$0xff]  ;;  %377 = vst [vmem:[%s1305_s25 + $0x68] sm:$0xff] %v376_v14 }
  0x29   : > { %379 = vst [vmem:[%s1305_s25 + $0x70] sm:$0xff] %v378_v15  ;;  %v380_v16 = vld [vmem:[%s1300_s24 + $0x1e0] sm:$0xff] }
  0x2a   : > { %v382_v17 = vld [vmem:[%s1300_s24 + $0x200] sm:$0xff]  ;;  %381 = vst [vmem:[%s1305_s25 + $0x78] sm:$0xff] %v380_v16 }
  0x2b   : > { %v384_v18 = vld [vmem:[%s1300_s24 + $0x220] sm:$0xff]  ;;  %383 = vst [vmem:[%s1305_s25 + $0x80] sm:$0xff] %v382_v17 }
  0x2c   : > { %385 = vst [vmem:[%s1305_s25 + $0x88] sm:$0xff] %v384_v18  ;;  %v386_v19 = vld [vmem:[%s1300_s24 + $0x240] sm:$0xff] }
  0x2d   : > { %v388_v20 = vld [vmem:[%s1300_s24 + $0x260] sm:$0xff]  ;;  %387 = vst [vmem:[%s1305_s25 + $0x90] sm:$0xff] %v386_v19 }
  0x2e   : > { %v390_v21 = vld [vmem:[%s1300_s24 + $0x280] sm:$0xff]  ;;  %389 = vst [vmem:[%s1305_s25 + $0x98] sm:$0xff] %v388_v20 }
  0x2f   : > { %391 = vst [vmem:[%s1305_s25 + $0xa0] sm:$0xff] %v390_v21  ;;  %v392_v22 = vld [vmem:[%s1300_s24 + $0x2a0] sm:$0xff] }
  0x30   : > { %v394_v23 = vld [vmem:[%s1300_s24 + $0x2c0] sm:$0xff]  ;;  %393 = vst [vmem:[%s1305_s25 + $0xa8] sm:$0xff] %v392_v22 }
  0x31   : > { %v396_v24 = vld [vmem:[%s1300_s24 + $0x2e0] sm:$0xff]  ;;  %395 = vst [vmem:[%s1305_s25 + $0xb0] sm:$0xff] %v394_v23 }
  0x32   : > { %397 = vst [vmem:[%s1305_s25 + $0xb8] sm:$0xff] %v396_v24  ;;  %v398_v25 = vld [vmem:[%s1300_s24 + $0x300] sm:$0xff] }
  0x33   : > { %v400_v26 = vld [vmem:[%s1300_s24 + $0x320] sm:$0xff]  ;;  %399 = vst [vmem:[%s1305_s25 + $0xc0] sm:$0xff] %v398_v25 }
  0x34   : > { %v402_v27 = vld [vmem:[%s1300_s24 + $0x340] sm:$0xff]  ;;  %401 = vst [vmem:[%s1305_s25 + $0xc8] sm:$0xff] %v400_v26 }
  0x35   : > { %403 = vst [vmem:[%s1305_s25 + $0xd0] sm:$0xff] %v402_v27  ;;  %v404_v28 = vld [vmem:[%s1300_s24 + $0x360] sm:$0xff] }
  0x36   : > { %v406_v29 = vld [vmem:[%s1300_s24 + $0x380] sm:$0xff]  ;;  %405 = vst [vmem:[%s1305_s25 + $0xd8] sm:$0xff] %v404_v28 }
  0x37   : > { %v408_v30 = vld [vmem:[%s1300_s24 + $0x3a0] sm:$0xff]  ;;  %407 = vst [vmem:[%s1305_s25 + $0xe0] sm:$0xff] %v406_v29 }
  0x38   : > { %409 = vst [vmem:[%s1305_s25 + $0xe8] sm:$0xff] %v408_v30  ;;  %v410_v31 = vld [vmem:[%s1300_s24 + $0x3c0] sm:$0xff] }
  0x39   : > { %v412_v32 = vld [vmem:[%s1300_s24 + $0x3e0] sm:$0xff]  ;;  %411 = vst [vmem:[%s1305_s25 + $0xf0] sm:$0xff] %v410_v31 }
  0x3a   : > { %413 = vst [vmem:[%s1305_s25 + $0xf8] sm:$0xff] %v412_v32 }
  0x3b PF: > { %419 = sbr.rel (!%p1277_p3) target bundleno = 69 (0x45), region = 78  ;;  %s421_s12 = sand.u32 (%p1277_p3), 1, %s1165_s27  }
  0x3c   : > { %s946_s13 = sshll.u32 (%p1277_p3), %s1181_s8, 4  ;;  %s945_s14 = sshll.u32 (%p1277_p3), %s421_s12, 5 }
  0x3d   : > { %s425_s15 = sadd.s32 (%p1277_p3), %s1177_s30, %s946_s13  ;;  %s423_s21 = scalar_lea.vmem (%p1277_p3), [#allocation4], %s945_s14 }
  0x3e   : > { %s947_s17 = sshll.u32 (%p1277_p3), %s425_s15, 3 }
  0x3f   : > { %s427_s20 = scalar_lea.vmem (%p1277_p3), %s1471_s1, %s947_s17 }
  0x40   : > { %v461_v33 = vld [vmem:[%s427_s20] sm:$0xff] (%p1277_p3) }
  0x41   : > { %v463_v34 = vld [vmem:[%s427_s20 + $0x20] sm:$0xff] (%p1277_p3)  ;;  %462 = vst [vmem:[%s423_s21] sm:$0xff] (%p1277_p3), %v461_v33 }
  0x42   : > { %v465_v35 = vld [vmem:[%s427_s20 + $0x40] sm:$0xff]  ;;  %464 = vst [vmem:[%s423_s21 + $0x8] sm:$0xff] %v463_v34 }
  0x43   : > { %466 = vst [vmem:[%s423_s21 + $0x10] sm:$0xff] %v465_v35  ;;  %v467_v36 = vld [vmem:[%s427_s20 + $0x60] sm:$0xff] }
  0x44   : > { %468 = vst [vmem:[%s423_s21 + $0x18] sm:$0xff] %v467_v36 }
  0x45 PF: > { %p948_p7 = scmp.ge.s32.totalorder %s1185_s9, 1  ;;  %p473_p8 = scmp.lt.s32.totalorder %s1185_s9, 9 }
  0x47   : > { %p474_p9 = pnand %p948_p7, %p473_p8 }
  0x48   : > { %s480_s11 = sand.u32 (!%p474_p9), 1, %s1161_s26   ;;  %v567_v37 = vld [vmem:[%s1473_s3] sm:$0xff] (!%p474_p9)  ;;  %vm585_vm0 = vcmask (!%p474_p9), 261120   ;;  %v532_v38 = vld [vmem:[%s1472_s2 + $0x8] sm:$0xff] (!%p474_p9)  ;;  %v1187_v39 = vmov (!%p474_p9), 0   ;;  %v534_v34 = vld [vmem:[%s1472_s2 + $0x18] sm:$0xff] (!%p474_p9) }
  0x49   : > { %477 = sbr.rel (%p474_p9) target bundleno = 581 (0x245), region = 116  ;;  %s949_s12 = sshll.u32 (!%p474_p9), %s480_s11, 8  ;;  %1012 = vmatprep.mubr.msk.f32.mxu0 (!%p474_p9), %vm585_vm0, %v567_v37  ;;  %731 = vmatprep.mubr.f32.mxu1 (!%p474_p9), %v532_v38  ;;  %v573_v40 = vld [vmem:[%s1474_s4] sm:$0xff] (!%p474_p9)  ;;  %v574_v41 = vld [vmem:[%s1474_s4 + $0x8] sm:$0xff] (!%p474_p9)  ;;  %v533_v35 = vld [vmem:[%s1472_s2 + $0x10] sm:$0xff] (!%p474_p9)  ;;  %v1188_v36 = vmov (!%p474_p9), 0.0|0.0  }
  0x4a   : > { %1125 = vset.pattern.permute.xlu0 (!%p474_p9), %v1187_v39  ;;  %1126 = vset.pattern.permute.xlu1 (!%p474_p9), %v1187_v39  ;;  %s1392_s17 = scalar_lea.vmem (!%p474_p9), [#allocation3], %s949_s12  ;;  %s950_s18 = sshll.u32 (!%p474_p9), %s480_s11, 5  ;;  %v568_v16 = vld [vmem:[%s1473_s3 + $0x8] sm:$0xff] (!%p474_p9)  ;;  %v531_v33 = vld [vmem:[%s1472_s2] sm:$0xff] (!%p474_p9)  ;;  %vm1189_vm1 = vmmov (!%p474_p9), 0   ;;  %v1190_v37 = vmov (!%p474_p9), 0.0  }
  0x4b   : > { %v551_v42 = vld [vmem:[%s1392_s17 + $0x80] sm:$0xff] (!%p474_p9)  ;;  %v552_v43 = vld [vmem:[%s1392_s17 + $0x88] sm:$0xff] (!%p474_p9)  ;;  %577 = vperm.xlu0 (!%p474_p9), %1125, %v573_v40   ;;  %v553_v47 = vld [vmem:[%s1392_s17 + $0x90] sm:$0xff] (!%p474_p9)  ;;  %s489_s19 = scalar_lea.vmem (!%p474_p9), [#allocation4], %s950_s18  ;;  %vm755_vm2 = vcmask (!%p474_p9), 130048   ;;  %p524_p10 = scmp.lt.s32.totalorder (!%p474_p9), %s1173_s29, 1 }
  0x4c   : > { %v535_v44 = vld [vmem:[%s1392_s17] sm:$0xff] (!%p474_p9)  ;;  %v1030_v45 = vpack.c.bf16 (!%p474_p9), %v552_v43, %v551_v42  ;;  %v536_v46 = vld [vmem:[%s1392_s17 + $0x8] sm:$0xff] (!%p474_p9)  ;;  %v554_v48 = vld [vmem:[%s1392_s17 + $0x98] sm:$0xff] (!%p474_p9)  ;;  %p526_p11 = scmp.lt.s32.totalorder (!%p474_p9), %s1169_s28, 3 }
  0x4d   : > { %v1032_v49 = vpack.c.bf16 (!%p474_p9), %v536_v46, %v535_v44  ;;  %v1034_v50 = vpack.c.bf16 (!%p474_p9), %v554_v48, %v553_v47  ;;  %v537_v51 = vld [vmem:[%s1392_s17 + $0x10] sm:$0xff] (!%p474_p9)  ;;  %v538_v52 = vld [vmem:[%s1392_s17 + $0x18] sm:$0xff] (!%p474_p9)  ;;  %v555_v53 = vld [vmem:[%s1392_s17 + $0xa0] sm:$0xff] (!%p474_p9) }
  0x4e   : > { %1031 = vmatprep.subr.bf16.mxu1 (!%p474_p9), %v1030_v45  ;;  %v556_v54 = vld [vmem:[%s1392_s17 + $0xa8] sm:$0xff] (!%p474_p9)  ;;  %v1036_v55 = vpack.c.bf16 (!%p474_p9), %v538_v52, %v537_v51  ;;  %v539_v57 = vld [vmem:[%s1392_s17 + $0x20] sm:$0xff] (!%p474_p9)  ;;  %v557_v59 = vld [vmem:[%s1392_s17 + $0xb0] sm:$0xff] (!%p474_p9) }
  0x4f   : > { %1033 = vmatpush3.bf16.msra.mxu1 (!%p474_p9), %v1032_v49  ;;  %582 = vperm.xlu0 (!%p474_p9), %1125, %v574_v41   ;;  %v1038_v56 = vpack.c.bf16 (!%p474_p9), %v556_v54, %v555_v53  ;;  %v540_v58 = vld [vmem:[%s1392_s17 + $0x28] sm:$0xff] (!%p474_p9)  ;;  %v558_v60 = vld [vmem:[%s1392_s17 + $0xb8] sm:$0xff] (!%p474_p9)  ;;  %v569_v62 = vld [vmem:[%s489_s19] sm:$0xff] (!%p474_p9) }
  0x50   : > { %1035 = vmatprep.subr.bf16.mxu1 %v1034_v50  ;;  %v1040_v61 = vpack.c.bf16 %v540_v58, %v539_v57  ;;  %v570_v63 = vld [vmem:[%s489_s19 + $0x8] sm:$0xff]  ;;  %v1042_v0 = vpack.c.bf16 %v558_v60, %v557_v59  ;;  %v541_v1 = vld [vmem:[%s1392_s17 + $0x30] sm:$0xff]  ;;  %v542_v2 = vld [vmem:[%s1392_s17 + $0x38] sm:$0xff]  ;;  %v751_v57 = vlaneseq  ;;  %s1492_s29 = smov (!%p524_p10, %s1173_s29), 1  ;;  %s1494_s28 = smov (!%p526_p11, %s1169_s28), 3 }
  0x51   : > { %v559_v3 = vld [vmem:[%s1392_s17 + $0xc0] sm:$0xff]  ;;  %v1022_v4 = vpack.c.bf16 %v570_v63, %v569_v62  ;;  %v560_v5 = vld [vmem:[%s1392_s17 + $0xc8] sm:$0xff]  ;;  %v571_v6 = vld [vmem:[%s489_s19 + $0x10] sm:$0xff]  ;;  %v1044_v9 = vpack.c.bf16 %v542_v2, %v541_v1  ;;  %s951_s26 = sshll.u32 %s1492_s29, 2 }
  0x52   : > { %v572_v7 = vld [vmem:[%s489_s19 + $0x18] sm:$0xff]  ;;  %v1046_v10 = vpack.c.bf16 %v560_v5, %v559_v3  ;;  %v543_v11 = vld [vmem:[%s1392_s17 + $0x40] sm:$0xff]  ;;  %v544_v12 = vld [vmem:[%s1392_s17 + $0x48] sm:$0xff]  ;;  %v752_v58 = vshrl.u32 %v751_v57, 7  ;;  %s529_s15 = sadd.s32 %s951_s26, %s1494_s28 }
  0x53   : > { %1037 = vmatpush3.bf16.msra.mxu1 %v1036_v55  ;;  %1023 = vmatprep.subr.bf16.mxu0 %v1022_v4  ;;  %v1026_v8 = vpack.c.bf16 %v572_v7, %v571_v6  ;;  %v561_v13 = vld [vmem:[%s1392_s17 + $0xd0] sm:$0xff]  ;;  %v562_v14 = vld [vmem:[%s1392_s17 + $0xd8] sm:$0xff]  ;;  %v1048_v15 = vpack.c.bf16 %v544_v12, %v543_v11  ;;  %v563_v20 = vld [vmem:[%s1392_s17 + $0xe0] sm:$0xff]  ;;  %s530_s19 = scalar_lea.vmem %s1477_s7, %s529_s15 }
  0x54   : > { %1039 = vmatprep.subr.bf16.mxu1 %v1038_v56  ;;  %1025 = vmatpush3.bf16.msra.mxu0 %v1022_v4  ;;  %v1050_v17 = vpack.c.bf16 %v562_v14, %v561_v13  ;;  %v545_v18 = vld [vmem:[%s1392_s17 + $0x50] sm:$0xff]  ;;  %v546_v19 = vld [vmem:[%s1392_s17 + $0x58] sm:$0xff]  ;;  %v564_v21 = vld [vmem:[%s1392_s17 + $0xe8] sm:$0xff]  ;;  %v753_v59 = vsub.s32 0, %v752_v58 }
  0x55   : > { %1027 = vmatprep.subr.bf16.mxu0 %v1026_v8  ;;  %v1052_v22 = vpack.c.bf16 %v546_v19, %v545_v18  ;;  %v1054_v23 = vpack.c.bf16 %v564_v21, %v563_v20  ;;  %v547_v24 = vld [vmem:[%s1392_s17 + $0x60] sm:$0xff]  ;;  %v548_v25 = vld [vmem:[%s1392_s17 + $0x68] sm:$0xff]  ;;  %v565_v26 = vld [vmem:[%s1392_s17 + $0xf0] sm:$0xff] }
  0x56   : > { %v566_v27 = vld [vmem:[%s1392_s17 + $0xf8] sm:$0xff]  ;;  %v1056_v28 = vpack.c.bf16 %v548_v25, %v547_v24  ;;  %v549_v30 = vld [vmem:[%s1392_s17 + $0x70] sm:$0xff] }
  0x57   : > { %1041 = vmatpush3.bf16.msra.mxu1 %v1040_v61  ;;  %v1058_v29 = vpack.c.bf16 %v566_v27, %v565_v26  ;;  %v550_v31 = vld [vmem:[%s1392_s17 + $0x78] sm:$0xff] }
  0x58   : > { %1043 = vmatprep.subr.bf16.mxu1 %v1042_v0  ;;  %1029 = vmatpush3.bf16.msra.mxu0 %v1026_v8  ;;  %v1060_v32 = vpack.c.bf16 %v550_v31, %v549_v30  ;;  %v745_v38 = vld [vmem:[#allocation2] sm:$0x1] }
  0x59   : > { %1062 = vmatprep.subr.bf16.mxu0 %v1188_v36  ;;  %748 = vperm.xlu1 %1126, %v745_v38   ;;  %v744_v56 = vld [vmem:[%s1475_s5] sm:$0x1] }
  0x5b   : > { %1045 = vmatpush3.bf16.msra.mxu1 %v1044_v9  ;;  %1013 = vmatmul.mubr.msk.f32.vlgmr.msra.gmra.mrb[0].mxu0 %vm585_vm0, %v568_v16 }
  0x5c   : > { %1047 = vmatprep.subr.bf16.mxu1 %v1046_v10  ;;  %1019 = vmatprep.mubr.msk.f32.mxu0 %vm1189_vm1, %v1190_v37 }
  0x5f   : > { %1049 = vmatpush3.bf16.msra.mxu1 %v1048_v15 }
  0x60   : > { %1051 = vmatprep.subr.bf16.mxu1 %v1050_v17 }
  0x63   : > { %1053 = vmatpush3.bf16.msra.mxu1 %v1052_v22 }
  0x64   : > { %1055 = vmatprep.subr.bf16.mxu1 %v1054_v23 }
  0x67   : > { %1057 = vmatpush3.bf16.msra.mxu1 %v1056_v28 }
  0x68   : > { %1059 = vmatprep.subr.bf16.mxu1 %v1058_v29 }
  0x6b   : > { %1061 = vmatpush3.bf16.msra.mxu1 %v1060_v32 }
  0x6e   : > { %732 = vmatmul.mubr.f32.vlgmr.msra.gmra.mrb[0].mxu1 %v531_v33 }
  0x6f   : > { %736 = vmatprep.mubr.f32.mxu1 %v534_v34 }
  0x72   : > { %737 = vmatmul.mubr.f32.gmra.mrb[2].mxu1 %v533_v35 }
  0xca   : > { %v578_v41 = vpop.permute.xlu0 %577 }
  0xce   : > { %v583_v46 = vpop.permute.xlu0 %582 }
  0xd8   : > { %v749_v60 = vpop.permute.xlu1 %748 }
  0xd9   : > { %v754_v61 = vrot.slane %v749_v60, %v753_v59 }
 0x12e   : > { %v1014_v39 = vpop.f32.mrb[0].mxu0 }
 0x12f   : > { %v658_v40 = vpop.f32.mrb[1].mxu0  ;;  %v664_v50 = vadd.f32 %v1014_v39, %v583_v46 }
 0x130   : > { %v659_v43 = vadd.f32 %v658_v40, %v578_v41 }
 0x141   : > { %v995_v42 = vpop.f32.mrb[0].mxu1 }
 0x142   : > { %v996_v44 = vpop.f32.mrb[1].mxu1 }
 0x143   : > { %v997_v45 = vadd.f32 %v996_v44, %v995_v42 }
 0x145   : > { %v734_v47 = vadd.f32 %v997_v45, %v659_v43  ;;  %v998_v48 = vpop.f32.mrb[2].mxu1 }
 0x146   : > { %v999_v49 = vpop.f32.mrb[3].mxu1 }
 0x147   : > { %v1000_v51 = vadd.f32 %v999_v49, %v998_v48  ;;  %v742_v53 = vmax.f32 %v734_v47, 0.0 }
 0x149   : > { %v739_v52 = vadd.f32 %v1000_v51, %v664_v50 }
 0x14b   : > { %v743_v54 = vmax.f32 %v739_v52, 0.0 }
 0x14d   : > { %v1063_v55 = vpack.c.bf16 %v743_v54, %v742_v53 }
 0x14f   : > { %1064 = vmatpush3.bf16.msra.mxu0 %v1063_v55 }
 0x152   : > { %1020 = vmatmul.mubr.msk.f32.vlgmr.msra.gmra.mrb[2].mxu0 %vm755_vm2, %v744_v56 }
 0x225   : > { %v825_v62 = vpop.f32.mrb[2].mxu0 }
 0x226   : > { %v826_v63 = vadd.f32 %v825_v62, %v754_v61  ;;  %v1021_v0 = vpop.f32.mrb[3].mxu0 }
 0x228   : > { %v829_v1 = vsub.f32 0.0, %v826_v63 }
 0x22a   : > { %v830_v2 = vmul.f32 1.442695, %v829_v1 }
 0x22c   : > { %1127 = vpow2.f32 %v830_v2 }
 0x236   : > { %v1128_v3 = vpop.eup %1127 }
 0x237   : > { %v832_v4 = vadd.f32 1.0, %v1128_v3 }
 0x239   : > { %1129 = vrcp.f32 %v832_v4 }
 0x243   : > { %v1130_v5 = vpop.eup %1129 }
 0x244   : > { %835 = vst [vmem:[%s530_s19] sm:$0x1] %v1130_v5 }
 0x245 PF: > { %s19_s9 = sadd.s32 1, %s1185_s9   ;;  %s1479_s26 = smov %s1165_s27 }
 0x246   : > { %p16_p12 = scmp.ge.s32.totalorder %s19_s9, 10   ;;  %s1480_s27 = smov %s1289_s16 }
 0x247   : > { %s1481_s28 = smov %s1177_s30  ;;  %s1482_s29 = smov %s1181_s8 }
 0x248   : > { %s1483_s30 = smov %s1486_s6  ;;  %s1484_s8 = smov %s1490_s10 }
 0x249   :  { %18 = sbr.rel (!%p16_p12) target bundleno = 7 (0x7), region = 167 }

// kernel: grid_attention_block_3d.6
= control target key start
LH: loop header
LB: loop body
LE: loop exit
PB: predicated region body
PF: predicated region fallthrough
CT: control target
= control target key end

     0   :  { %s1396_s18 = smov 0   ;;  %s1398_s19 = smov 0   ;;  %s1751_s0 = inlined_call_operand.vmem [shape: f32[2,32,4096], index: 0, kind: input, shape index: {}]   ;;  %s1752_s1 = inlined_call_operand.vmem [shape: f32[2,1,4096], index: 1, kind: input, shape index: {}]   ;;  %s1753_s2 = inlined_call_operand.vmem [shape: f32[32,32], index: 2, kind: input, shape index: {}]   ;;  %s1754_s3 = inlined_call_operand.vmem [shape: f32[32,1], index: 3, kind: input, shape index: {}]   ;;  %s1755_s4 = inlined_call_operand.vmem [shape: f32[8,32,1], index: 4, kind: output, shape index: {0}]   ;;  %s1756_s5 = inlined_call_operand.vmem [shape: f32[8,32,1], index: 5, kind: output, shape index: {1}]  }
   0x1   :  { %s1400_s20 = smov 0   ;;  %s1402_s21 = smov 0  }
   0x2   :  { %s1404_s22 = smov 0   ;;  %s1406_s23 = smov 0  }
   0x3   :  { %s1408_s24 = smov 0  }
   0x4 LB: > { %s25_s25 = sadd.s32 1, %s1354_s22  ;;  %s28_s26 = sadd.s32 1, %s1358_s23  ;;  %s1362_s24 = sphi %s1408_s24, %s16_s24   ;;  %s1358_s23 = sphi %s1406_s23, %s1762_s23   ;;  %s1354_s22 = sphi %s1404_s22, %s1761_s22   ;;  %s1350_s21 = sphi %s1402_s21, %s1760_s21   ;;  %s1346_s20 = sphi %s1400_s20, %s1759_s20   ;;  %s1342_s19 = sphi %s1398_s19, %s1758_s19   ;;  %s1338_s18 = sphi %s1396_s18, %s1757_s18  }
   0x5   : > { %p26_p0 = scmp.ge.s32.totalorder %s25_s25, 4  ;;  %p44_p1 = scmp.ne.s32.totalorder %s1342_s19, %s1338_s18 }
   0x6   : > { %p45_p2 = scmp.eq.s32.totalorder %s1362_s24, 0  ;;  %s37_s30 = sadd.s32 1, %s1342_s19 }
   0x7   : > { %s1764_s25 = smov (%p26_p0, %s25_s25), 0  ;;  %s1766_s26 = smov (!%p26_p0, %s28_s26), %s1358_s23 }
   0x8   : > { %p46_p3 = por %p45_p2, %p44_p1  ;;  %p30_p4 = scmp.ge.s32.totalorder %s1766_s26, 2 }
   0x9   : > { %s33_s27 = ssub.s32 %s1354_s22, %s1764_s25  ;;  %p1181_p6 = scmp.ge.s32.totalorder %s1362_s24, 8 }
   0xa   : > { %s1768_s26 = smov (%p30_p4, %s1766_s26), 0 }
   0xb   : > { %s32_s28 = ssub.s32 %s1358_s23, %s1768_s26  ;;  %206 = sbr.rel (%p1181_p6) target bundleno = 41 (0x29), region = 24 }
   0xc   : > { %s34_s29 = sor.u32 %s33_s27, %s32_s28 }
   0xd   : > { %p35_p5 = scmp.eq.s32.totalorder %s34_s29, 0 }
   0xf   : > { %s1447_s6 = scalar_select %p35_p5, %s1342_s19, %s37_s30  }
  0x12   : > { %209 = sbr.rel (!%p46_p3) target bundleno = 41 (0x29), region = 28  ;;  %s211_s7 = sand.u32 (%p46_p3), 1, %s1342_s19  }
  0x13   : > { %s1183_s8 = sshll.u32 (%p46_p3), %s1354_s22, 3  ;;  %s1182_s9 = sshll.u32 (%p46_p3), %s211_s7, 8 }
  0x14   : > { %s1184_s10 = sshll.u32 (%p46_p3), %s1358_s23, 7  ;;  %s1461_s16 = scalar_lea.vmem (%p46_p3), [#allocation2], %s1182_s9 }
  0x15   : > { %s216_s11 = sadd.s32 (%p46_p3), %s1184_s10, %s1183_s8 }
  0x16   : > { %s1185_s12 = sshll.u32 (%p46_p3), %s216_s11, 3 }
  0x17   : > { %s1456_s15 = scalar_lea.vmem (%p46_p3), %s1751_s0, %s1185_s12 }
  0x18   : > { %v231_v0 = vld [vmem:[%s1456_s15] sm:$0xff] (%p46_p3)  ;;  %v233_v1 = vld [vmem:[%s1456_s15 + $0x8] sm:$0xff] (%p46_p3)  ;;  %v235_v2 = vld [vmem:[%s1456_s15 + $0x10] sm:$0xff] (%p46_p3) }
  0x19   : > { %232 = vst [vmem:[%s1461_s16] sm:$0xff] %v231_v0  ;;  %234 = vst [vmem:[%s1461_s16 + $0x8] sm:$0xff] %v233_v1  ;;  %v237_v3 = vld [vmem:[%s1456_s15 + $0x18] sm:$0xff]  ;;  %v239_v4 = vld [vmem:[%s1456_s15 + $0x20] sm:$0xff] }
  0x1a   : > { %236 = vst [vmem:[%s1461_s16 + $0x10] sm:$0xff] %v235_v2  ;;  %v241_v5 = vld [vmem:[%s1456_s15 + $0x28] sm:$0xff]  ;;  %238 = vst [vmem:[%s1461_s16 + $0x18] sm:$0xff] %v237_v3  ;;  %v243_v6 = vld [vmem:[%s1456_s15 + $0x30] sm:$0xff] }
  0x1b   : > { %240 = vst [vmem:[%s1461_s16 + $0x20] sm:$0xff] %v239_v4  ;;  %242 = vst [vmem:[%s1461_s16 + $0x28] sm:$0xff] %v241_v5  ;;  %v245_v7 = vld [vmem:[%s1456_s15 + $0x38] sm:$0xff]  ;;  %v247_v8 = vld [vmem:[%s1456_s15 + $0x100] sm:$0xff] }
  0x1c   : > { %244 = vst [vmem:[%s1461_s16 + $0x30] sm:$0xff] %v243_v6  ;;  %246 = vst [vmem:[%s1461_s16 + $0x38] sm:$0xff] %v245_v7  ;;  %v249_v9 = vld [vmem:[%s1456_s15 + $0x108] sm:$0xff]  ;;  %v251_v10 = vld [vmem:[%s1456_s15 + $0x110] sm:$0xff] }
  0x1d   : > { %248 = vst [vmem:[%s1461_s16 + $0x40] sm:$0xff] %v247_v8  ;;  %v253_v11 = vld [vmem:[%s1456_s15 + $0x118] sm:$0xff]  ;;  %250 = vst [vmem:[%s1461_s16 + $0x48] sm:$0xff] %v249_v9  ;;  %v255_v12 = vld [vmem:[%s1456_s15 + $0x120] sm:$0xff] }
  0x1e   : > { %252 = vst [vmem:[%s1461_s16 + $0x50] sm:$0xff] %v251_v10  ;;  %254 = vst [vmem:[%s1461_s16 + $0x58] sm:$0xff] %v253_v11  ;;  %v257_v13 = vld [vmem:[%s1456_s15 + $0x128] sm:$0xff]  ;;  %v259_v14 = vld [vmem:[%s1456_s15 + $0x130] sm:$0xff] }
  0x1f   : > { %256 = vst [vmem:[%s1461_s16 + $0x60] sm:$0xff] %v255_v12  ;;  %258 = vst [vmem:[%s1461_s16 + $0x68] sm:$0xff] %v257_v13  ;;  %v261_v15 = vld [vmem:[%s1456_s15 + $0x138] sm:$0xff]  ;;  %v263_v16 = vld [vmem:[%s1456_s15 + $0x200] sm:$0xff] }
  0x20   : > { %260 = vst [vmem:[%s1461_s16 + $0x70] sm:$0xff] %v259_v14  ;;  %v265_v17 = vld [vmem:[%s1456_s15 + $0x208] sm:$0xff]  ;;  %262 = vst [vmem:[%s1461_s16 + $0x78] sm:$0xff] %v261_v15  ;;  %v267_v18 = vld [vmem:[%s1456_s15 + $0x210] sm:$0xff] }
  0x21   : > { %264 = vst [vmem:[%s1461_s16 + $0x80] sm:$0xff] %v263_v16  ;;  %266 = vst [vmem:[%s1461_s16 + $0x88] sm:$0xff] %v265_v17  ;;  %v269_v19 = vld [vmem:[%s1456_s15 + $0x218] sm:$0xff]  ;;  %v271_v20 = vld [vmem:[%s1456_s15 + $0x220] sm:$0xff] }
  0x22   : > { %268 = vst [vmem:[%s1461_s16 + $0x90] sm:$0xff] %v267_v18  ;;  %270 = vst [vmem:[%s1461_s16 + $0x98] sm:$0xff] %v269_v19  ;;  %v273_v21 = vld [vmem:[%s1456_s15 + $0x228] sm:$0xff]  ;;  %v275_v22 = vld [vmem:[%s1456_s15 + $0x230] sm:$0xff] }
  0x23   : > { %272 = vst [vmem:[%s1461_s16 + $0xa0] sm:$0xff] %v271_v20  ;;  %v277_v23 = vld [vmem:[%s1456_s15 + $0x238] sm:$0xff]  ;;  %274 = vst [vmem:[%s1461_s16 + $0xa8] sm:$0xff] %v273_v21  ;;  %v279_v24 = vld [vmem:[%s1456_s15 + $0x300] sm:$0xff] }
  0x24   : > { %276 = vst [vmem:[%s1461_s16 + $0xb0] sm:$0xff] %v275_v22  ;;  %278 = vst [vmem:[%s1461_s16 + $0xb8] sm:$0xff] %v277_v23  ;;  %v281_v25 = vld [vmem:[%s1456_s15 + $0x308] sm:$0xff]  ;;  %v283_v26 = vld [vmem:[%s1456_s15 + $0x310] sm:$0xff] }
  0x25   : > { %280 = vst [vmem:[%s1461_s16 + $0xc0] sm:$0xff] %v279_v24  ;;  %282 = vst [vmem:[%s1461_s16 + $0xc8] sm:$0xff] %v281_v25  ;;  %v285_v27 = vld [vmem:[%s1456_s15 + $0x318] sm:$0xff]  ;;  %v287_v28 = vld [vmem:[%s1456_s15 + $0x320] sm:$0xff] }
  0x26   : > { %284 = vst [vmem:[%s1461_s16 + $0xd0] sm:$0xff] %v283_v26  ;;  %v289_v29 = vld [vmem:[%s1456_s15 + $0x328] sm:$0xff]  ;;  %286 = vst [vmem:[%s1461_s16 + $0xd8] sm:$0xff] %v285_v27  ;;  %v291_v30 = vld [vmem:[%s1456_s15 + $0x330] sm:$0xff] }
  0x27   : > { %288 = vst [vmem:[%s1461_s16 + $0xe0] sm:$0xff] %v287_v28  ;;  %290 = vst [vmem:[%s1461_s16 + $0xe8] sm:$0xff] %v289_v29  ;;  %v293_v31 = vld [vmem:[%s1456_s15 + $0x338] sm:$0xff] }
  0x28   : > { %292 = vst [vmem:[%s1461_s16 + $0xf0] sm:$0xff] %v291_v30  ;;  %294 = vst [vmem:[%s1461_s16 + $0xf8] sm:$0xff] %v293_v31 }
  0x29 PF: > { %p1186_p7 = scmp.ge.s32.totalorder %s1362_s24, 1  ;;  %p311_p8 = scmp.lt.s32.totalorder %s1362_s24, 9 }
  0x2b   : > { %p312_p9 = pnand %p1186_p7, %p311_p8 }
  0x2c   : > { %s318_s17 = sand.u32 (!%p312_p9), 1, %s1338_s18   ;;  %v1364_v32 = vmov (!%p312_p9), 0.0   ;;  %v869_v33 = vld [vmem:[%s1754_s3] sm:$0xff] (!%p312_p9)  ;;  %v1365_v34 = vmov (!%p312_p9), 0   ;;  %v871_v35 = vld [vmem:[%s1754_s3 + $0x10] sm:$0xff] (!%p312_p9)  ;;  %v870_v39 = vld [vmem:[%s1754_s3 + $0x8] sm:$0xff] (!%p312_p9)  ;;  %v797_v26 = vlaneseq (!%p312_p9) }
  0x2d   : > { %315 = sbr.rel (%p312_p9) target bundleno = 466 (0x1d2), region = 55  ;;  %s1187_s27 = sshll.u32 (!%p312_p9), %s318_s17, 8  ;;  %503 = vmatprep.mubr.f32.mxu0 (!%p312_p9), %v1364_v32  ;;  %592 = vmatprep.mubr.f32.mxu1 (!%p312_p9), %v1364_v32  ;;  %v872_v49 = vld [vmem:[%s1754_s3 + $0x18] sm:$0xff] (!%p312_p9)  ;;  %v390_v7 = vld [vmem:[%s1753_s2] sm:$0xff] (!%p312_p9)  ;;  %vm426_vm0 = vcmask (!%p312_p9), 261120   ;;  %v391_v21 = vld [vmem:[%s1753_s2 + $0x8] sm:$0xff] (!%p312_p9) }
  0x2e   : > { %1306 = vset.pattern.permute.xlu0 (!%p312_p9), %v1365_v34  ;;  %1307 = vset.pattern.permute.xlu1 (!%p312_p9), %v1365_v34  ;;  %s1535_s8 = scalar_lea.vmem (!%p312_p9), [#allocation2], %s1187_s27  ;;  %v392_v24 = vld [vmem:[%s1753_s2 + $0x10] sm:$0xff] (!%p312_p9)  ;;  %v393_v25 = vld [vmem:[%s1753_s2 + $0x18] sm:$0xff] (!%p312_p9)  ;;  %s1188_s29 = sshll.u32 (!%p312_p9), %s1346_s20, 3  ;;  %v798_v27 = vshrl.u32 (!%p312_p9), %v797_v26, 7  ;;  %vm961_vm1 = vcmask (!%p312_p9), 7168  }
  0x2f   : > { %v395_v36 = vld [vmem:[%s1535_s8 + $0x8] sm:$0xff] (!%p312_p9)  ;;  %v397_v38 = vld [vmem:[%s1535_s8 + $0x18] sm:$0xff] (!%p312_p9)  ;;  %875 = vperm.xlu0 (!%p312_p9), %1306, %v869_v33   ;;  %885 = vperm.xlu1 (!%p312_p9), %1307, %v871_v35   ;;  %v394_v42 = vld [vmem:[%s1535_s8] sm:$0xff] (!%p312_p9)  ;;  %p364_p10 = scmp.lt.s32.totalorder (!%p312_p9), %s1350_s21, 1  ;;  %p366_p11 = scmp.lt.s32.totalorder (!%p312_p9), %s1188_s29, 31 }
  0x30   : > { %v403_v37 = vld [vmem:[%s1535_s8 + $0x48] sm:$0xff] (!%p312_p9)  ;;  %v405_v41 = vld [vmem:[%s1535_s8 + $0x58] sm:$0xff] (!%p312_p9)  ;;  %v402_v43 = vld [vmem:[%s1535_s8 + $0x40] sm:$0xff] (!%p312_p9)  ;;  %v799_v28 = vsub.s32 (!%p312_p9), 0, %v798_v27  ;;  %v803_v30 = vsub.s32 (!%p312_p9), 1, %v798_v27  ;;  %v807_v31 = vsub.s32 (!%p312_p9), 2, %v798_v27 }
  0x31   : > { %v1216_v40 = vpack.c.bf16 (!%p312_p9), %v403_v37, %v395_v36  ;;  %v1224_v44 = vpack.c.bf16 (!%p312_p9), %v405_v41, %v397_v38  ;;  %v1218_v45 = vpack.c.bf16 (!%p312_p9), %v402_v43, %v394_v42  ;;  %v396_v46 = vld [vmem:[%s1535_s8 + $0x10] sm:$0xff] (!%p312_p9)  ;;  %v411_v48 = vld [vmem:[%s1535_s8 + $0x88] sm:$0xff] (!%p312_p9)  ;;  %v413_v52 = vld [vmem:[%s1535_s8 + $0x98] sm:$0xff] (!%p312_p9)  ;;  %s1190_s11 = sshll.u32 (!%p312_p9), %s1350_s21, 2 }
  0x32   : > { %v404_v47 = vld [vmem:[%s1535_s8 + $0x50] sm:$0xff] (!%p312_p9)  ;;  %v419_v51 = vld [vmem:[%s1535_s8 + $0xc8] sm:$0xff] (!%p312_p9)  ;;  %v421_v53 = vld [vmem:[%s1535_s8 + $0xd8] sm:$0xff] (!%p312_p9)  ;;  %s373_s12 = sadd.s32 (!%p312_p9), %s1346_s20, %s1190_s11 }
  0x33   : > { %1217 = vmatprep.subr.bf16.mxu0 (!%p312_p9), %v1216_v40  ;;  %v1226_v50 = vpack.c.bf16 (!%p312_p9), %v404_v47, %v396_v46  ;;  %1225 = vmatprep.subr.bf16.mxu1 (!%p312_p9), %v1224_v44  ;;  %v1220_v54 = vpack.c.bf16 (!%p312_p9), %v419_v51, %v411_v48  ;;  %v1228_v55 = vpack.c.bf16 (!%p312_p9), %v421_v53, %v413_v52  ;;  %v410_v56 = vld [vmem:[%s1535_s8 + $0x80] sm:$0xff] (!%p312_p9)  ;;  %v412_v58 = vld [vmem:[%s1535_s8 + $0x90] sm:$0xff] (!%p312_p9)  ;;  %v399_v61 = vld [vmem:[%s1535_s8 + $0x28] sm:$0xff] (!%p312_p9)  ;;  %v823_v40 = vsub.s32 (!%p312_p9), 6, %v798_v27  ;;  %p374_p12 = scmp.lt.s32.totalorder (!%p312_p9), %s373_s12, 7 }
  0x34   : > { %1219 = vmatpush1.bf16.msra.mxu0 %v1218_v45  ;;  %v418_v57 = vld [vmem:[%s1535_s8 + $0xc0] sm:$0xff]  ;;  %v420_v60 = vld [vmem:[%s1535_s8 + $0xd0] sm:$0xff]  ;;  %v407_v62 = vld [vmem:[%s1535_s8 + $0x68] sm:$0xff]  ;;  %880 = vperm.xlu0 %1306, %v870_v39   ;;  %s365_s30 = scalar_select %p364_p10, %s1350_s21, 1  ;;  %v815_v39 = vsub.s32 4, %v798_v27  ;;  %v819_v44 = vsub.s32 5, %v798_v27 }
  0x35   : > { %1227 = vmatpush1.bf16.msra.mxu1 %v1226_v50  ;;  %v1222_v59 = vpack.c.bf16 %v418_v57, %v410_v56  ;;  %1221 = vmatprep.subr.bf16.mxu0 %v1220_v54  ;;  %v1230_v63 = vpack.c.bf16 %v420_v60, %v412_v58  ;;  %v1232_v0 = vpack.c.bf16 %v407_v62, %v399_v61  ;;  %v398_v1 = vld [vmem:[%s1535_s8 + $0x20] sm:$0xff]  ;;  %v401_v3 = vld [vmem:[%s1535_s8 + $0x38] sm:$0xff]  ;;  %v400_v5 = vld [vmem:[%s1535_s8 + $0x30] sm:$0xff]  ;;  %s1770_s29 = smov (!%p366_p11, %s1188_s29), 31  ;;  %v827_v50 = vsub.s32 7, %v798_v27  ;;  %s1772_s12 = smov (!%p374_p12, %s373_s12), 7 }
  0x36   : > { %1229 = vmatprep.subr.bf16.mxu1 %v1228_v55  ;;  %v406_v2 = vld [vmem:[%s1535_s8 + $0x60] sm:$0xff]  ;;  %v409_v4 = vld [vmem:[%s1535_s8 + $0x78] sm:$0xff]  ;;  %v408_v6 = vld [vmem:[%s1535_s8 + $0x70] sm:$0xff]  ;;  %890 = vperm.xlu1 %1307, %v872_v49   ;;  %s1189_s7 = sshll.u32 %s365_s30, 5  ;;  %s1214_s13 = sshll.u32 %s1772_s12, 5 }
  0x37   : > { %v1234_v8 = vpack.c.bf16 %v406_v2, %v398_v1  ;;  %v1240_v9 = vpack.c.bf16 %v409_v4, %v401_v3  ;;  %v415_v10 = vld [vmem:[%s1535_s8 + $0xa8] sm:$0xff]  ;;  %v417_v12 = vld [vmem:[%s1535_s8 + $0xb8] sm:$0xff]  ;;  %v1242_v14 = vpack.c.bf16 %v408_v6, %v400_v5  ;;  %v414_v16 = vld [vmem:[%s1535_s8 + $0xa0] sm:$0xff]  ;;  %s378_s16 = scalar_lea.vmem %s1755_s4, %s1214_s13  ;;  %s387_s28 = scalar_lea.vmem %s1756_s5, %s1214_s13 }
  0x38   : > { %1223 = vmatpush1.bf16.msra.mxu0 %v1222_v59  ;;  %v423_v11 = vld [vmem:[%s1535_s8 + $0xe8] sm:$0xff]  ;;  %v425_v13 = vld [vmem:[%s1535_s8 + $0xf8] sm:$0xff]  ;;  %v422_v17 = vld [vmem:[%s1535_s8 + $0xe0] sm:$0xff] }
  0x39   : > { %1231 = vmatpush1.bf16.msra.mxu1 %v1230_v63  ;;  %1233 = vmatprep.subr.bf16.mxu0 %v1232_v0  ;;  %v1236_v15 = vpack.c.bf16 %v423_v11, %v415_v10  ;;  %v1244_v18 = vpack.c.bf16 %v425_v13, %v417_v12  ;;  %v416_v19 = vld [vmem:[%s1535_s8 + $0xb0] sm:$0xff]  ;;  %v1238_v22 = vpack.c.bf16 %v422_v17, %v414_v16 }
  0x3a   : > { %1241 = vmatprep.subr.bf16.mxu1 %v1240_v9  ;;  %v424_v20 = vld [vmem:[%s1535_s8 + $0xf0] sm:$0xff]  ;;  %s369_s8 = sadd.s32 %s1189_s7, %s1770_s29 }
  0x3b   : > { %1196 = vmatmul.mubr.msk.f32.vlgmr.msra.gmra.mrb[0].mxu0 %vm426_vm0, %v390_v7  ;;  %v1246_v23 = vpack.c.bf16 %v424_v20, %v416_v19  ;;  %s370_s10 = scalar_lea.vmem %s1752_s1, %s369_s8 }
  0x3c   : > { %1200 = vmatmul.mubr.msk.f32.vlgmr.msra.gmra.mrb[0].mxu1 %vm426_vm0, %v390_v7  ;;  %1235 = vmatpush1.bf16.msra.mxu0 %v1234_v8  ;;  %v795_v29 = vld [vmem:[%s370_s10] sm:$0xff] }
  0x3d   : > { %509 = vmatprep.mubr.f32.mxu0 %v1364_v32  ;;  %598 = vmatprep.mubr.f32.mxu1 %v1364_v32  ;;  %v1623_v33 = vrot.slane %v795_v29, %v799_v28  ;;  %v1625_v34 = vrot.slane %v795_v29, %v803_v30  ;;  %v1629_v36 = vrot.slane %v795_v29, %v807_v31 }
  0x3e   : > { %1243 = vmatpush1.bf16.msra.mxu1 %v1242_v14  ;;  %1237 = vmatprep.subr.bf16.mxu0 %v1236_v15  ;;  %v1642_v55 = vrot.slane %v795_v29, %v815_v39  ;;  %v1644_v56 = vrot.slane %v795_v29, %v823_v40  ;;  %v1648_v62 = vrot.slane %v795_v29, %v819_v44 }
  0x3f   : > { %1197 = vmatmul.mubr.msk.f32.gmra.mrb[2].mxu0 %vm426_vm0, %v391_v21  ;;  %1245 = vmatprep.subr.bf16.mxu1 %v1244_v18  ;;  %v1656_v8 = vrot.slane %v795_v29, %v827_v50 }
  0x40   : > { %1201 = vmatmul.mubr.msk.f32.gmra.mrb[2].mxu1 %vm426_vm0, %v391_v21  ;;  %515 = vmatprep.mubr.f32.mxu0 %v1364_v32 }
  0x41   : > { %604 = vmatprep.mubr.f32.mxu1 %v1364_v32  ;;  %1239 = vmatpush1.bf16.msra.mxu0 %v1238_v22 }
  0x42   : > { %1247 = vmatpush1.bf16.msra.mxu1 %v1246_v23 }
  0x43   : > { %1198 = vmatmul.mubr.msk.f32.gmra.mrb[4].mxu0 %vm426_vm0, %v392_v24 }
  0x44   : > { %1202 = vmatmul.mubr.msk.f32.gmra.mrb[4].mxu1 %vm426_vm0, %v392_v24  ;;  %521 = vmatprep.mubr.f32.mxu0 %v1364_v32 }
  0x45   : > { %610 = vmatprep.mubr.f32.mxu1 %v1364_v32 }
  0x47   : > { %1199 = vmatmul.mubr.msk.f32.gmra.mrb[6].mxu0 %vm426_vm0, %v393_v25 }
  0x48   : > { %1203 = vmatmul.mubr.msk.f32.gmra.mrb[6].mxu1 %vm426_vm0, %v393_v25  ;;  %681 = vmatprep.mubr.f32.mxu0 %v1364_v32 }
  0x49   : > { %770 = vmatprep.mubr.f32.mxu1 %v1364_v32 }
  0x4b   : > { %1204 = vmatmul.mubr.msk.f32.vlgmr.msra.gmra.mrb[8].mxu0 %vm426_vm0, %v390_v7 }
  0x4c   : > { %1208 = vmatmul.mubr.msk.f32.vlgmr.msra.gmra.mrb[8].mxu1 %vm426_vm0, %v390_v7  ;;  %687 = vmatprep.mubr.f32.mxu0 %v1364_v32 }
  0x4d   : > { %776 = vmatprep.mubr.f32.mxu1 %v1364_v32 }
  0x4f   : > { %1205 = vmatmul.mubr.msk.f32.gmra.mrb[10].mxu0 %vm426_vm0, %v391_v21 }
  0x50   : > { %1209 = vmatmul.mubr.msk.f32.gmra.mrb[10].mxu1 %vm426_vm0, %v391_v21  ;;  %693 = vmatprep.mubr.f32.mxu0 %v1364_v32 }
  0x51   : > { %782 = vmatprep.mubr.f32.mxu1 %v1364_v32 }
  0x53   : > { %1206 = vmatmul.mubr.msk.f32.gmra.mrb[12].mxu0 %vm426_vm0, %v392_v24 }
  0x54   : > { %1210 = vmatmul.mubr.msk.f32.gmra.mrb[12].mxu1 %vm426_vm0, %v392_v24  ;;  %699 = vmatprep.mubr.f32.mxu0 %v1364_v32 }
  0x55   : > { %788 = vmatprep.mubr.f32.mxu1 %v1364_v32  ;;  %v811_v32 = vsub.s32 3, %v798_v27 }
  0x57   : > { %1207 = vmatmul.mubr.msk.f32.gmra.mrb[14].mxu0 %vm426_vm0, %v393_v25  ;;  %v1631_v37 = vrot.slane %v795_v29, %v811_v32 }
  0x58   : > { %1211 = vmatmul.mubr.msk.f32.gmra.mrb[14].mxu1 %vm426_vm0, %v393_v25 }
  0xae   : > { %v1627_v35 = vpop.permute.xlu0 %875  ;;  %v1651_v4 = vpop.permute.xlu1 %885 }
  0xb3   : > { %v1640_v54 = vpop.permute.xlu0 %880 }
  0xb5   : > { %v1665_v39 = vpop.permute.xlu1 %890 }
 0x10e   : > { %v505_v38 = vpop.f32.mrb[0].mxu0 }
 0x10f   : > { %v837_v41 = vmul.f32 %v1623_v33, %v505_v38  ;;  %v507_v42 = vpop.f32.mrb[1].mxu0  ;;  %v594_v43 = vpop.f32.mrb[0].mxu1 }
 0x110   : > { %v838_v45 = vmul.f32 %v1625_v34, %v507_v42  ;;  %v839_v46 = vmul.f32 %v1629_v36, %v594_v43  ;;  %v596_v47 = vpop.f32.mrb[1].mxu1 }
 0x111   : > { %v893_v48 = vadd.f32 %v1627_v35, %v837_v41  ;;  %v840_v49 = vmul.f32 %v1631_v37, %v596_v47 }
 0x112   : > { %v894_v51 = vadd.f32 %v1627_v35, %v838_v45  ;;  %v895_v52 = vadd.f32 %v1627_v35, %v839_v46  ;;  %v511_v53 = vpop.f32.mrb[2].mxu0 }
 0x113   : > { %v966_v57 = vmul.f32 %v893_v48, %v893_v48  ;;  %v845_v58 = vmul.f32 %v1623_v33, %v511_v53  ;;  %v513_v59 = vpop.f32.mrb[3].mxu0  ;;  %v896_v60 = vadd.f32 %v1627_v35, %v840_v49  ;;  %v600_v61 = vpop.f32.mrb[2].mxu1 }
 0x114   : > { %v925_v63 = vadd.f32 %v894_v51, %v893_v48  ;;  %v967_v0 = vmul.f32 %v894_v51, %v894_v51  ;;  %v968_v1 = vmul.f32 %v895_v52, %v895_v52  ;;  %v846_v2 = vmul.f32 %v1625_v34, %v513_v59  ;;  %v602_v3 = vpop.f32.mrb[3].mxu1 }
 0x115   : > { %v847_v5 = vmul.f32 %v1629_v36, %v600_v61  ;;  %v901_v6 = vadd.f32 %v1640_v54, %v845_v58  ;;  %v848_v7 = vmul.f32 %v1631_v37, %v602_v3  ;;  %v969_v11 = vmul.f32 %v896_v60, %v896_v60 }
 0x116   : > { %v926_v9 = vadd.f32 %v925_v63, %v895_v52  ;;  %v998_v10 = vadd.f32 %v967_v0, %v966_v57  ;;  %v902_v12 = vadd.f32 %v1640_v54, %v846_v2  ;;  %v517_v13 = vpop.f32.mrb[4].mxu0 }
 0x117   : > { %v903_v14 = vadd.f32 %v1640_v54, %v847_v5  ;;  %v974_v15 = vmul.f32 %v901_v6, %v901_v6  ;;  %v853_v16 = vmul.f32 %v1623_v33, %v517_v13  ;;  %v519_v17 = vpop.f32.mrb[5].mxu0  ;;  %v904_v18 = vadd.f32 %v1640_v54, %v848_v7  ;;  %v606_v19 = vpop.f32.mrb[4].mxu1 }
 0x118   : > { %v999_v20 = vadd.f32 %v998_v10, %v968_v1  ;;  %v927_v21 = vadd.f32 %v926_v9, %v896_v60  ;;  %v934_v22 = vadd.f32 %v902_v12, %v901_v6  ;;  %v975_v23 = vmul.f32 %v902_v12, %v902_v12  ;;  %v608_v24 = vpop.f32.mrb[5].mxu1 }
 0x119   : > { %v976_v25 = vmul.f32 %v903_v14, %v903_v14  ;;  %v854_v26 = vmul.f32 %v1625_v34, %v519_v17  ;;  %v977_v27 = vmul.f32 %v904_v18, %v904_v18  ;;  %v855_v28 = vmul.f32 %v1629_v36, %v606_v19 }
 0x11a   : > { %v1000_v29 = vadd.f32 %v999_v20, %v969_v11  ;;  %v935_v30 = vadd.f32 %v934_v22, %v903_v14  ;;  %v1007_v31 = vadd.f32 %v975_v23, %v974_v15  ;;  %v909_v32 = vadd.f32 %v1651_v4, %v853_v16  ;;  %v523_v38 = vpop.f32.mrb[6].mxu0 }
 0x11b   : > { %v910_v40 = vadd.f32 %v1651_v4, %v854_v26  ;;  %v911_v41 = vadd.f32 %v1651_v4, %v855_v28  ;;  %v861_v42 = vmul.f32 %v1623_v33, %v523_v38  ;;  %v525_v43 = vpop.f32.mrb[7].mxu0  ;;  %v856_v44 = vmul.f32 %v1631_v37, %v608_v24  ;;  %v612_v45 = vpop.f32.mrb[6].mxu1 }
 0x11c   : > { %v1008_v46 = vadd.f32 %v1007_v31, %v976_v25  ;;  %v936_v47 = vadd.f32 %v935_v30, %v904_v18  ;;  %v982_v48 = vmul.f32 %v909_v32, %v909_v32  ;;  %v862_v49 = vmul.f32 %v1625_v34, %v525_v43  ;;  %v614_v50 = vpop.f32.mrb[7].mxu1 }
 0x11d   : > { %v943_v51 = vadd.f32 %v910_v40, %v909_v32  ;;  %v983_v52 = vmul.f32 %v910_v40, %v910_v40  ;;  %v984_v53 = vmul.f32 %v911_v41, %v911_v41  ;;  %v912_v57 = vadd.f32 %v1651_v4, %v856_v44 }
 0x11e   : > { %v1673_v58 = vadd.f32 %v1008_v46, %v977_v27  ;;  %v863_v59 = vmul.f32 %v1629_v36, %v612_v45  ;;  %v864_v33 = vmul.f32 %v1631_v37, %v614_v50  ;;  %v917_v60 = vadd.f32 %v1665_v39, %v861_v42  ;;  %v683_v61 = vpop.f32.mrb[8].mxu0 }
 0x11f   : > { %v944_v63 = vadd.f32 %v943_v51, %v911_v41  ;;  %v1016_v0 = vadd.f32 %v983_v52, %v982_v48  ;;  %v985_v1 = vmul.f32 %v912_v57, %v912_v57  ;;  %v918_v34 = vadd.f32 %v1665_v39, %v862_v49  ;;  %v772_v2 = vpop.f32.mrb[8].mxu1  ;;  %v685_v3 = vpop.f32.mrb[9].mxu0 }
 0x120   : > { %v919_v5 = vadd.f32 %v1665_v39, %v863_v59  ;;  %v920_v6 = vadd.f32 %v1665_v39, %v864_v33  ;;  %v990_v7 = vmul.f32 %v917_v60, %v917_v60  ;;  %v841_v9 = vmul.f32 %v1642_v55, %v683_v61  ;;  %v774_v36 = vpop.f32.mrb[9].mxu1 }
 0x121   : > { %v1017_v10 = vadd.f32 %v1016_v0, %v984_v53  ;;  %v945_v37 = vadd.f32 %v944_v63, %v912_v57  ;;  %v952_v11 = vadd.f32 %v918_v34, %v917_v60  ;;  %v991_v12 = vmul.f32 %v918_v34, %v918_v34 }
 0x122   : > { %v992_v13 = vmul.f32 %v919_v5, %v919_v5  ;;  %v993_v14 = vmul.f32 %v920_v6, %v920_v6  ;;  %v897_v15 = vadd.f32 %v1627_v35, %v841_v9  ;;  %v843_v16 = vmul.f32 %v1644_v56, %v772_v2  ;;  %v689_v17 = vpop.f32.mrb[10].mxu0 }
 0x123   : > { %v1018_v18 = vadd.f32 %v1017_v10, %v985_v1  ;;  %v953_v19 = vadd.f32 %v952_v11, %v919_v5  ;;  %v1025_v20 = vadd.f32 %v991_v12, %v990_v7  ;;  %v842_v22 = vmul.f32 %v1648_v62, %v685_v3  ;;  %v778_v23 = vpop.f32.mrb[10].mxu1  ;;  %v691_v24 = vpop.f32.mrb[11].mxu0 }
 0x124   : > { %v928_v25 = vadd.f32 %v927_v21, %v897_v15  ;;  %v970_v26 = vmul.f32 %v897_v15, %v897_v15  ;;  %v899_v27 = vadd.f32 %v1627_v35, %v843_v16  ;;  %v780_v28 = vpop.f32.mrb[11].mxu1  ;;  %v849_v38 = vmul.f32 %v1642_v55, %v689_v17 }
 0x125   : > { %v954_v30 = vadd.f32 %v953_v19, %v920_v6  ;;  %v1026_v31 = vadd.f32 %v1025_v20, %v992_v13  ;;  %v898_v32 = vadd.f32 %v1627_v35, %v842_v22  ;;  %v844_v41 = vmul.f32 %v1656_v8, %v774_v36 }
 0x126   : > { %v1001_v40 = vadd.f32 %v1000_v29, %v970_v26  ;;  %v851_v42 = vmul.f32 %v1644_v56, %v778_v23  ;;  %v695_v43 = vpop.f32.mrb[12].mxu0  ;;  %v972_v45 = vmul.f32 %v899_v27, %v899_v27  ;;  %v905_v21 = vadd.f32 %v1640_v54, %v849_v38 }
 0x127   : > { %v1027_v44 = vadd.f32 %v1026_v31, %v993_v14  ;;  %v929_v46 = vadd.f32 %v928_v25, %v898_v32  ;;  %v784_v48 = vpop.f32.mrb[12].mxu1  ;;  %v697_v49 = vpop.f32.mrb[13].mxu0  ;;  %v850_v51 = vmul.f32 %v1648_v62, %v691_v24  ;;  %v852_v52 = vmul.f32 %v1656_v8, %v780_v28 }
 0x128   : > { %v907_v50 = vadd.f32 %v1640_v54, %v851_v42  ;;  %v857_v29 = vmul.f32 %v1642_v55, %v695_v43  ;;  %v786_v53 = vpop.f32.mrb[13].mxu1  ;;  %v937_v57 = vadd.f32 %v936_v47, %v905_v21  ;;  %v978_v59 = vmul.f32 %v905_v21, %v905_v21 }
 0x129   : > { %v859_v33 = vmul.f32 %v1644_v56, %v784_v48  ;;  %v858_v60 = vmul.f32 %v1648_v62, %v697_v49  ;;  %v971_v61 = vmul.f32 %v898_v32, %v898_v32  ;;  %v900_v63 = vadd.f32 %v1627_v35, %v844_v41 }
 0x12a   : > { %v906_v0 = vadd.f32 %v1640_v54, %v850_v51  ;;  %v913_v1 = vadd.f32 %v1651_v4, %v857_v29  ;;  %v701_v34 = vpop.f32.mrb[14].mxu0  ;;  %v1010_v2 = vadd.f32 %v1673_v58, %v978_v59  ;;  %v980_v3 = vmul.f32 %v907_v50, %v907_v50 }
 0x12b   : > { %v915_v5 = vadd.f32 %v1651_v4, %v859_v33  ;;  %v914_v47 = vadd.f32 %v1651_v4, %v858_v60  ;;  %v790_v6 = vpop.f32.mrb[14].mxu1  ;;  %v703_v7 = vpop.f32.mrb[15].mxu0  ;;  %v860_v11 = vmul.f32 %v1656_v8, %v786_v53  ;;  %v908_v13 = vadd.f32 %v1640_v54, %v852_v52 }
 0x12c   : > { %v938_v9 = vadd.f32 %v937_v57, %v906_v0  ;;  %v946_v36 = vadd.f32 %v945_v37, %v913_v1  ;;  %v986_v10 = vmul.f32 %v913_v1, %v913_v1  ;;  %v792_v35 = vpop.f32.mrb[15].mxu1  ;;  %v979_v12 = vmul.f32 %v906_v0, %v906_v0 }
 0x12d   : > { %v988_v14 = vmul.f32 %v915_v5, %v915_v5  ;;  %v865_v15 = vmul.f32 %v1642_v55, %v701_v34  ;;  %v867_v17 = vmul.f32 %v1644_v56, %v790_v6  ;;  %v868_v19 = vmul.f32 %v1656_v8, %v792_v35 }
 0x12e   : > { %v1019_v58 = vadd.f32 %v1018_v18, %v986_v10  ;;  %v947_v16 = vadd.f32 %v946_v36, %v914_v47  ;;  %v987_v20 = vmul.f32 %v914_v47, %v914_v47  ;;  %v930_v37 = vadd.f32 %v929_v46, %v899_v27 }
 0x12f   : > { %v921_v22 = vadd.f32 %v1665_v39, %v865_v15  ;;  %v866_v23 = vmul.f32 %v1648_v62, %v703_v7  ;;  %v916_v24 = vadd.f32 %v1651_v4, %v860_v11  ;;  %v923_v25 = vadd.f32 %v1665_v39, %v867_v17 }
 0x130   : > { %v973_v54 = vmul.f32 %v900_v63, %v900_v63  ;;  %v1002_v26 = vadd.f32 %v1001_v40, %v971_v61  ;;  %v931_v18 = vadd.f32 %v930_v37, %v900_v63  ;;  %v924_v56 = vadd.f32 %v1665_v39, %v868_v19 }
 0x131   : > { %v955_v28 = vadd.f32 %v954_v30, %v921_v22  ;;  %v994_v55 = vmul.f32 %v921_v22, %v921_v22  ;;  %v922_v31 = vadd.f32 %v1665_v39, %v866_v23  ;;  %v1011_v32 = vadd.f32 %v1010_v2, %v979_v12 }
 0x132   : > { %v1003_v8 = vadd.f32 %v1002_v26, %v972_v45  ;;  %v939_v38 = vadd.f32 %v938_v9, %v907_v50  ;;  %932 = vadd.xlane.f32.xlu0 %v931_v18  ;;  %v981_v42 = vmul.f32 %v908_v13, %v908_v13  ;;  %v1020_v21 = vadd.f32 %v1019_v58, %v987_v20 }
 0x133   : > { %v1028_v41 = vadd.f32 %v1027_v44, %v994_v55  ;;  %v956_v27 = vadd.f32 %v955_v28, %v922_v31  ;;  %v995_v62 = vmul.f32 %v922_v31, %v922_v31  ;;  %v1012_v43 = vadd.f32 %v1011_v32, %v980_v3 }
 0x134   : > { %v1004_v4 = vadd.f32 %v1003_v8, %v973_v54  ;;  %v940_v46 = vadd.f32 %v939_v38, %v908_v13  ;;  %v996_v40 = vmul.f32 %v923_v25, %v923_v25  ;;  %v948_v30 = vadd.f32 %v947_v16, %v915_v5 }
 0x135   : > { %v957_v48 = vadd.f32 %v956_v27, %v923_v25  ;;  %v1029_v49 = vadd.f32 %v1028_v41, %v995_v62  ;;  %v1013_v51 = vadd.f32 %v1012_v43, %v981_v42  ;;  %v989_v39 = vmul.f32 %v916_v24, %v916_v24 }
 0x136   : > { %1005 = vadd.xlane.f32.xlu1 %v1004_v4  ;;  %v1021_v45 = vadd.f32 %v1020_v21, %v988_v14  ;;  %v949_v50 = vadd.f32 %v948_v30, %v916_v24  ;;  %v997_v52 = vmul.f32 %v924_v56, %v924_v56 }
 0x137   : > { %v958_v44 = vadd.f32 %v957_v48, %v924_v56  ;;  %v1030_v29 = vadd.f32 %v1029_v49, %v996_v40  ;;  %1014 = vadd.xlane.f32.xlu0 %v1013_v51 }
 0x138   : > { %v1022_v53 = vadd.f32 %v1021_v45, %v989_v39 }
 0x139   : > { %v1031_v57 = vadd.f32 %v1030_v29, %v997_v52 }
 0x13a   : > { %941 = vadd.xlane.f32.xlu1 %v940_v46 }
 0x13b   : > { %950 = vadd.xlane.f32.xlu0 %v949_v50 }
 0x13e   : > { %1023 = vadd.xlane.f32.xlu1 %v1022_v53 }
 0x13f   : > { %959 = vadd.xlane.f32.xlu0 %v958_v44 }
 0x143   : > { %1032 = vadd.xlane.f32.xlu0 %v1031_v57 }
 0x1bf   : > { %v933_v59 = vpop.xlane.xlu0 %932 }
 0x1c0   : > { %962 = vst.msk [vmem:[%s378_s16] sm:$0xff] %vm961_vm1, %v933_v59 }
 0x1c3   : > { %v1006_v33 = vpop.xlane.xlu1 %1005 }
 0x1c4   : > { %1034 = vst.msk [vmem:[%s387_s28] sm:$0xff] %vm961_vm1, %v1006_v33  ;;  %v1015_v60 = vpop.xlane.xlu0 %1014 }
 0x1c5   : > { %1035 = vst.msk [vmem:[%s387_s28 + $0x8] sm:$0xff] %vm961_vm1, %v1015_v60 }
 0x1c7   : > { %v942_v61 = vpop.xlane.xlu1 %941 }
 0x1c8   : > { %963 = vst.msk [vmem:[%s378_s16 + $0x8] sm:$0xff] %vm961_vm1, %v942_v61  ;;  %v951_v63 = vpop.xlane.xlu0 %950 }
 0x1c9   : > { %964 = vst.msk [vmem:[%s378_s16 + $0x10] sm:$0xff] %vm961_vm1, %v951_v63 }
 0x1cb   : > { %v1024_v0 = vpop.xlane.xlu1 %1023 }
 0x1cc   : > { %1036 = vst.msk [vmem:[%s387_s28 + $0x10] sm:$0xff] %vm961_vm1, %v1024_v0  ;;  %v960_v1 = vpop.xlane.xlu0 %959 }
 0x1cd   : > { %965 = vst.msk [vmem:[%s378_s16 + $0x18] sm:$0xff] %vm961_vm1, %v960_v1 }
 0x1d0   : > { %v1033_v34 = vpop.xlane.xlu0 %1032 }
 0x1d1   : > { %1037 = vst.msk [vmem:[%s387_s28 + $0x18] sm:$0xff] %vm961_vm1, %v1033_v34 }
 0x1d2 PF: > { %s16_s24 = sadd.s32 1, %s1362_s24   ;;  %s1757_s18 = smov %s1342_s19 }
 0x1d3   : > { %p13_p13 = scmp.ge.s32.totalorder %s16_s24, 10   ;;  %s1758_s19 = smov %s1447_s6 }
 0x1d4   : > { %s1759_s20 = smov %s1354_s22  ;;  %s1760_s21 = smov %s1358_s23 }
 0x1d5   : > { %s1761_s22 = smov %s1764_s25  ;;  %s1762_s23 = smov %s1768_s26 }
 0x1d6   :  { %15 = sbr.rel (!%p13_p13) target bundleno = 4 (0x4), region = 109 }

// kernel: grid_attention_block_3d.7
= control target key start
LH: loop header
LB: loop body
LE: loop exit
PB: predicated region body
PF: predicated region fallthrough
CT: control target
= control target key end

     0   :  { %s1284_s15 = smov 0   ;;  %s1286_s16 = smov 0   ;;  %s1754_s0 = inlined_call_operand.vmem [shape: f32[2,32,4096], index: 0, kind: input, shape index: {}]   ;;  %s1755_s1 = inlined_call_operand.vmem [shape: f32[2,1,4096], index: 1, kind: input, shape index: {}]   ;;  %s1756_s2 = inlined_call_operand.vmem [shape: f32[32,32], index: 2, kind: input, shape index: {}]   ;;  %s1757_s3 = inlined_call_operand.vmem [shape: f32[32,1], index: 3, kind: input, shape index: {}]   ;;  %s1758_s4 = inlined_call_operand.vmem [shape: f32[2,32,4096], index: 4, kind: output, shape index: {}]  }
   0x1   :  { %s1288_s17 = smov 0   ;;  %s1290_s18 = smov 0  }
   0x2   :  { %s1292_s19 = smov 0   ;;  %s1294_s20 = smov 0  }
   0x3   :  { %s1296_s21 = smov 0  }
   0x4 LB: > { %s23_s22 = sadd.s32 1, %s1247_s19  ;;  %s26_s23 = sadd.s32 1, %s1251_s20  ;;  %s1255_s21 = sphi %s1296_s21, %s14_s21   ;;  %s1251_s20 = sphi %s1294_s20, %s1765_s20   ;;  %s1247_s19 = sphi %s1292_s19, %s1764_s19   ;;  %s1243_s18 = sphi %s1290_s18, %s1763_s18   ;;  %s1239_s17 = sphi %s1288_s17, %s1762_s17   ;;  %s1235_s16 = sphi %s1286_s16, %s1761_s16   ;;  %s1231_s15 = sphi %s1284_s15, %s1760_s15  }
   0x5   : > { %p24_p0 = scmp.ge.s32.totalorder %s23_s22, 4  ;;  %s1074_s24 = sadd.s32 4294967295, %s1255_s21  }
   0x6   : > { %p42_p1 = scmp.ne.s32.totalorder %s1235_s16, %s1231_s15  ;;  %p43_p2 = scmp.eq.s32.totalorder %s1255_s21, 0 }
   0x7   : > { %s1767_s22 = smov (%p24_p0, %s23_s22), 0  ;;  %s1769_s23 = smov (!%p24_p0, %s26_s23), %s1251_s20 }
   0x8   : > { %p28_p3 = scmp.ge.s32.totalorder %s1769_s23, 2  ;;  %p144_p4 = scmp.eq.s32.totalorder %s1074_s24, 7 }
   0x9   : > { %s31_s25 = ssub.s32 %s1247_s19, %s1767_s22  ;;  %p44_p5 = por %p43_p2, %p42_p1 }
   0xa   : > { %s1771_s23 = smov (%p28_p3, %s1769_s23), 0  ;;  %p1332_p6 = por %p144_p4, %p42_p1 }
   0xb   : > { %s30_s27 = ssub.s32 %s1251_s20, %s1771_s23  ;;  %s35_s29 = sadd.s32 1, %s1235_s16 }
   0xc   : > { %s32_s28 = sor.u32 %s31_s25, %s30_s27  ;;  %p1077_p8 = scmp.ge.s32.totalorder %s1255_s21, 8 }
   0xd   : > { %p33_p7 = scmp.eq.s32.totalorder %s32_s28, 0 }
   0xe   : > { %172 = sbr.rel (%p1077_p8) target bundleno = 44 (0x2c), region = 24 }
   0xf   : > { %s1340_s30 = scalar_select %p33_p7, %s1235_s16, %s35_s29  }
  0x15   : > { %175 = sbr.rel (!%p44_p5) target bundleno = 44 (0x2c), region = 28  ;;  %s177_s5 = sand.u32 (%p44_p5), 1, %s1235_s16  }
  0x16   : > { %s1079_s6 = sshll.u32 (%p44_p5), %s1247_s19, 3  ;;  %s1078_s7 = sshll.u32 (%p44_p5), %s177_s5, 8 }
  0x17   : > { %s1080_s8 = sshll.u32 (%p44_p5), %s1251_s20, 7  ;;  %s1354_s14 = scalar_lea.vmem (%p44_p5), [#allocation2], %s1078_s7 }
  0x18   : > { %s182_s9 = sadd.s32 (%p44_p5), %s1080_s8, %s1079_s6 }
  0x19   : > { %s1081_s10 = sshll.u32 (%p44_p5), %s182_s9, 3 }
  0x1a   : > { %s1349_s13 = scalar_lea.vmem (%p44_p5), %s1754_s0, %s1081_s10 }
  0x1b   : > { %v197_v0 = vld [vmem:[%s1349_s13] sm:$0xff] (%p44_p5)  ;;  %v199_v1 = vld [vmem:[%s1349_s13 + $0x8] sm:$0xff] (%p44_p5)  ;;  %v201_v2 = vld [vmem:[%s1349_s13 + $0x10] sm:$0xff] (%p44_p5) }
  0x1c   : > { %198 = vst [vmem:[%s1354_s14] sm:$0xff] %v197_v0  ;;  %200 = vst [vmem:[%s1354_s14 + $0x8] sm:$0xff] %v199_v1  ;;  %v203_v3 = vld [vmem:[%s1349_s13 + $0x18] sm:$0xff]  ;;  %v205_v4 = vld [vmem:[%s1349_s13 + $0x20] sm:$0xff] }
  0x1d   : > { %202 = vst [vmem:[%s1354_s14 + $0x10] sm:$0xff] %v201_v2  ;;  %v207_v5 = vld [vmem:[%s1349_s13 + $0x28] sm:$0xff]  ;;  %204 = vst [vmem:[%s1354_s14 + $0x18] sm:$0xff] %v203_v3  ;;  %v209_v6 = vld [vmem:[%s1349_s13 + $0x30] sm:$0xff] }
  0x1e   : > { %206 = vst [vmem:[%s1354_s14 + $0x20] sm:$0xff] %v205_v4  ;;  %208 = vst [vmem:[%s1354_s14 + $0x28] sm:$0xff] %v207_v5  ;;  %v211_v7 = vld [vmem:[%s1349_s13 + $0x38] sm:$0xff]  ;;  %v213_v8 = vld [vmem:[%s1349_s13 + $0x100] sm:$0xff] }
  0x1f   : > { %210 = vst [vmem:[%s1354_s14 + $0x30] sm:$0xff] %v209_v6  ;;  %212 = vst [vmem:[%s1354_s14 + $0x38] sm:$0xff] %v211_v7  ;;  %v215_v9 = vld [vmem:[%s1349_s13 + $0x108] sm:$0xff]  ;;  %v217_v10 = vld [vmem:[%s1349_s13 + $0x110] sm:$0xff] }
  0x20   : > { %214 = vst [vmem:[%s1354_s14 + $0x40] sm:$0xff] %v213_v8  ;;  %v219_v11 = vld [vmem:[%s1349_s13 + $0x118] sm:$0xff]  ;;  %216 = vst [vmem:[%s1354_s14 + $0x48] sm:$0xff] %v215_v9  ;;  %v221_v12 = vld [vmem:[%s1349_s13 + $0x120] sm:$0xff] }
  0x21   : > { %218 = vst [vmem:[%s1354_s14 + $0x50] sm:$0xff] %v217_v10  ;;  %220 = vst [vmem:[%s1354_s14 + $0x58] sm:$0xff] %v219_v11  ;;  %v223_v13 = vld [vmem:[%s1349_s13 + $0x128] sm:$0xff]  ;;  %v225_v14 = vld [vmem:[%s1349_s13 + $0x130] sm:$0xff] }
  0x22   : > { %222 = vst [vmem:[%s1354_s14 + $0x60] sm:$0xff] %v221_v12  ;;  %224 = vst [vmem:[%s1354_s14 + $0x68] sm:$0xff] %v223_v13  ;;  %v227_v15 = vld [vmem:[%s1349_s13 + $0x138] sm:$0xff]  ;;  %v229_v16 = vld [vmem:[%s1349_s13 + $0x200] sm:$0xff] }
  0x23   : > { %226 = vst [vmem:[%s1354_s14 + $0x70] sm:$0xff] %v225_v14  ;;  %v231_v17 = vld [vmem:[%s1349_s13 + $0x208] sm:$0xff]  ;;  %228 = vst [vmem:[%s1354_s14 + $0x78] sm:$0xff] %v227_v15  ;;  %v233_v18 = vld [vmem:[%s1349_s13 + $0x210] sm:$0xff] }
  0x24   : > { %230 = vst [vmem:[%s1354_s14 + $0x80] sm:$0xff] %v229_v16  ;;  %232 = vst [vmem:[%s1354_s14 + $0x88] sm:$0xff] %v231_v17  ;;  %v235_v19 = vld [vmem:[%s1349_s13 + $0x218] sm:$0xff]  ;;  %v237_v20 = vld [vmem:[%s1349_s13 + $0x220] sm:$0xff] }
  0x25   : > { %234 = vst [vmem:[%s1354_s14 + $0x90] sm:$0xff] %v233_v18  ;;  %236 = vst [vmem:[%s1354_s14 + $0x98] sm:$0xff] %v235_v19  ;;  %v239_v21 = vld [vmem:[%s1349_s13 + $0x228] sm:$0xff]  ;;  %v241_v22 = vld [vmem:[%s1349_s13 + $0x230] sm:$0xff] }
  0x26   : > { %238 = vst [vmem:[%s1354_s14 + $0xa0] sm:$0xff] %v237_v20  ;;  %v243_v23 = vld [vmem:[%s1349_s13 + $0x238] sm:$0xff]  ;;  %240 = vst [vmem:[%s1354_s14 + $0xa8] sm:$0xff] %v239_v21  ;;  %v245_v24 = vld [vmem:[%s1349_s13 + $0x300] sm:$0xff] }
  0x27   : > { %242 = vst [vmem:[%s1354_s14 + $0xb0] sm:$0xff] %v241_v22  ;;  %244 = vst [vmem:[%s1354_s14 + $0xb8] sm:$0xff] %v243_v23  ;;  %v247_v25 = vld [vmem:[%s1349_s13 + $0x308] sm:$0xff]  ;;  %v249_v26 = vld [vmem:[%s1349_s13 + $0x310] sm:$0xff] }
  0x28   : > { %246 = vst [vmem:[%s1354_s14 + $0xc0] sm:$0xff] %v245_v24  ;;  %248 = vst [vmem:[%s1354_s14 + $0xc8] sm:$0xff] %v247_v25  ;;  %v251_v27 = vld [vmem:[%s1349_s13 + $0x318] sm:$0xff]  ;;  %v253_v28 = vld [vmem:[%s1349_s13 + $0x320] sm:$0xff] }
  0x29   : > { %250 = vst [vmem:[%s1354_s14 + $0xd0] sm:$0xff] %v249_v26  ;;  %v255_v29 = vld [vmem:[%s1349_s13 + $0x328] sm:$0xff]  ;;  %252 = vst [vmem:[%s1354_s14 + $0xd8] sm:$0xff] %v251_v27  ;;  %v257_v30 = vld [vmem:[%s1349_s13 + $0x330] sm:$0xff] }
  0x2a   : > { %254 = vst [vmem:[%s1354_s14 + $0xe0] sm:$0xff] %v253_v28  ;;  %256 = vst [vmem:[%s1354_s14 + $0xe8] sm:$0xff] %v255_v29  ;;  %v259_v31 = vld [vmem:[%s1349_s13 + $0x338] sm:$0xff] }
  0x2b   : > { %258 = vst [vmem:[%s1354_s14 + $0xf0] sm:$0xff] %v257_v30  ;;  %260 = vst [vmem:[%s1354_s14 + $0xf8] sm:$0xff] %v259_v31 }
  0x2c PF: > { %p1082_p9 = scmp.ge.s32.totalorder %s1255_s21, 1  ;;  %p277_p10 = scmp.lt.s32.totalorder %s1255_s21, 9 }
  0x2e   : > { %p278_p11 = pnand %p1082_p9, %p277_p10 }
  0x2f   : > { %s284_s24 = sand.u32 (!%p278_p11), 1, %s1231_s15   ;;  %v1257_v32 = vmov (!%p278_p11), 0.0   ;;  %v806_v33 = vld [vmem:[%s1757_s3] sm:$0xff] (!%p278_p11)  ;;  %v1258_v34 = vmov (!%p278_p11), 0   ;;  %v808_v35 = vld [vmem:[%s1757_s3 + $0x10] sm:$0xff] (!%p278_p11)  ;;  %v807_v39 = vld [vmem:[%s1757_s3 + $0x8] sm:$0xff] (!%p278_p11)  ;;  %v734_v26 = vlaneseq (!%p278_p11) }
  0x30   : > { %281 = sbr.rel (%p278_p11) target bundleno = 317 (0x13d), region = 55  ;;  %s1420_s25 = sshll.u32 (!%p278_p11), %s284_s24, 8  ;;  %440 = vmatprep.mubr.f32.mxu0 (!%p278_p11), %v1257_v32  ;;  %529 = vmatprep.mubr.f32.mxu1 (!%p278_p11), %v1257_v32  ;;  %v809_v49 = vld [vmem:[%s1757_s3 + $0x18] sm:$0xff] (!%p278_p11)  ;;  %v327_v0 = vld [vmem:[%s1756_s2] sm:$0xff] (!%p278_p11)  ;;  %vm363_vm0 = vcmask (!%p278_p11), 261120   ;;  %v328_v21 = vld [vmem:[%s1756_s2 + $0x8] sm:$0xff] (!%p278_p11) }
  0x31   : > { %1199 = vset.pattern.permute.xlu0 (!%p278_p11), %v1258_v34  ;;  %1200 = vset.pattern.permute.xlu1 (!%p278_p11), %v1258_v34  ;;  %s1431_s15 = scalar_lea.vmem (!%p278_p11), [#allocation2], %s1420_s25  ;;  %v329_v24 = vld [vmem:[%s1756_s2 + $0x10] sm:$0xff] (!%p278_p11)  ;;  %v330_v25 = vld [vmem:[%s1756_s2 + $0x18] sm:$0xff] (!%p278_p11)  ;;  %s1514_s29 = sshll.u32 (!%p278_p11), %s1239_s17, 3  ;;  %v1520_v27 = vshrl.u32 (!%p278_p11), %v734_v26, 7 }
  0x32   : > { %v332_v36 = vld [vmem:[%s1431_s15 + $0x8] sm:$0xff] (!%p278_p11)  ;;  %v334_v38 = vld [vmem:[%s1431_s15 + $0x18] sm:$0xff] (!%p278_p11)  ;;  %812 = vperm.xlu0 (!%p278_p11), %1199, %v806_v33   ;;  %822 = vperm.xlu1 (!%p278_p11), %1200, %v808_v35   ;;  %v331_v42 = vld [vmem:[%s1431_s15] sm:$0xff] (!%p278_p11)  ;;  %p318_p12 = scmp.lt.s32.totalorder (!%p278_p11), %s1243_s18, 1  ;;  %p320_p13 = scmp.lt.s32.totalorder (!%p278_p11), %s1514_s29, 31 }
  0x33   : > { %v340_v37 = vld [vmem:[%s1431_s15 + $0x48] sm:$0xff] (!%p278_p11)  ;;  %v342_v41 = vld [vmem:[%s1431_s15 + $0x58] sm:$0xff] (!%p278_p11)  ;;  %v339_v43 = vld [vmem:[%s1431_s15 + $0x40] sm:$0xff] (!%p278_p11)  ;;  %v736_v28 = vsub.s32 (!%p278_p11), 0, %v1520_v27  ;;  %v744_v30 = vsub.s32 (!%p278_p11), 2, %v1520_v27  ;;  %v740_v31 = vsub.s32 (!%p278_p11), 1, %v1520_v27 }
  0x34   : > { %v1109_v40 = vpack.c.bf16 (!%p278_p11), %v340_v37, %v332_v36  ;;  %v1117_v44 = vpack.c.bf16 (!%p278_p11), %v342_v41, %v334_v38  ;;  %v1111_v45 = vpack.c.bf16 (!%p278_p11), %v339_v43, %v331_v42  ;;  %v333_v46 = vld [vmem:[%s1431_s15 + $0x10] sm:$0xff] (!%p278_p11)  ;;  %v348_v48 = vld [vmem:[%s1431_s15 + $0x88] sm:$0xff] (!%p278_p11)  ;;  %v350_v52 = vld [vmem:[%s1431_s15 + $0x98] sm:$0xff] (!%p278_p11)  ;;  %s1553_s17 = scalar_lea.vmem (!%p278_p11), [#allocation3], %s1420_s25 }
  0x35   : > { %v341_v47 = vld [vmem:[%s1431_s15 + $0x50] sm:$0xff] (!%p278_p11)  ;;  %v356_v51 = vld [vmem:[%s1431_s15 + $0xc8] sm:$0xff] (!%p278_p11)  ;;  %v358_v53 = vld [vmem:[%s1431_s15 + $0xd8] sm:$0xff] (!%p278_p11) }
  0x36   : > { %1110 = vmatprep.subr.bf16.mxu0 (!%p278_p11), %v1109_v40  ;;  %v1119_v50 = vpack.c.bf16 (!%p278_p11), %v341_v47, %v333_v46  ;;  %1118 = vmatprep.subr.bf16.mxu1 (!%p278_p11), %v1117_v44  ;;  %v1113_v54 = vpack.c.bf16 (!%p278_p11), %v356_v51, %v348_v48  ;;  %v1121_v55 = vpack.c.bf16 (!%p278_p11), %v358_v53, %v350_v52  ;;  %v347_v56 = vld [vmem:[%s1431_s15 + $0x80] sm:$0xff] (!%p278_p11)  ;;  %v349_v58 = vld [vmem:[%s1431_s15 + $0x90] sm:$0xff] (!%p278_p11)  ;;  %v336_v61 = vld [vmem:[%s1431_s15 + $0x28] sm:$0xff] (!%p278_p11) }
  0x37   : > { %1112 = vmatpush1.bf16.msra.mxu0 %v1111_v45  ;;  %v355_v57 = vld [vmem:[%s1431_s15 + $0xc0] sm:$0xff]  ;;  %v357_v60 = vld [vmem:[%s1431_s15 + $0xd0] sm:$0xff]  ;;  %v344_v62 = vld [vmem:[%s1431_s15 + $0x68] sm:$0xff]  ;;  %817 = vperm.xlu0 %1199, %v807_v39   ;;  %s319_s5 = scalar_select %p318_p12, %s1243_s18, 1 }
  0x38   : > { %1120 = vmatpush1.bf16.msra.mxu1 %v1119_v50  ;;  %v1115_v59 = vpack.c.bf16 %v355_v57, %v347_v56  ;;  %1114 = vmatprep.subr.bf16.mxu0 %v1113_v54  ;;  %v1123_v63 = vpack.c.bf16 %v357_v60, %v349_v58  ;;  %v1125_v1 = vpack.c.bf16 %v344_v62, %v336_v61  ;;  %v338_v2 = vld [vmem:[%s1431_s15 + $0x38] sm:$0xff]  ;;  %v335_v4 = vld [vmem:[%s1431_s15 + $0x20] sm:$0xff]  ;;  %v337_v7 = vld [vmem:[%s1431_s15 + $0x30] sm:$0xff]  ;;  %s1105_s25 = sshll.u32 (%p1332_p6), %s1243_s18, 7 }
  0x39   : > { %1122 = vmatprep.subr.bf16.mxu1 %v1121_v55  ;;  %v346_v3 = vld [vmem:[%s1431_s15 + $0x78] sm:$0xff]  ;;  %v343_v6 = vld [vmem:[%s1431_s15 + $0x60] sm:$0xff]  ;;  %v345_v8 = vld [vmem:[%s1431_s15 + $0x70] sm:$0xff]  ;;  %827 = vperm.xlu1 %1200, %v809_v49   ;;  %s1086_s6 = sshll.u32 %s319_s5, 5  ;;  %s903_s26 = sadd.s32 (%p1332_p6), %s1105_s25, %s1514_s29 }
  0x3a   : > { %v1133_v5 = vpack.c.bf16 %v346_v3, %v338_v2  ;;  %v1127_v9 = vpack.c.bf16 %v343_v6, %v335_v4  ;;  %v352_v10 = vld [vmem:[%s1431_s15 + $0xa8] sm:$0xff]  ;;  %v354_v12 = vld [vmem:[%s1431_s15 + $0xb8] sm:$0xff]  ;;  %v1135_v13 = vpack.c.bf16 %v345_v8, %v337_v7  ;;  %v351_v16 = vld [vmem:[%s1431_s15 + $0xa0] sm:$0xff]  ;;  %v752_v4 = vsub.s32 4, %v1520_v27  ;;  %s1106_s11 = sshll.u32 (%p1332_p6), %s903_s26, 3 }
  0x3b   : > { %1116 = vmatpush1.bf16.msra.mxu0 %v1115_v59  ;;  %v360_v11 = vld [vmem:[%s1431_s15 + $0xe8] sm:$0xff]  ;;  %v362_v14 = vld [vmem:[%s1431_s15 + $0xf8] sm:$0xff]  ;;  %v359_v17 = vld [vmem:[%s1431_s15 + $0xe0] sm:$0xff]  ;;  %v760_v8 = vsub.s32 6, %v1520_v27  ;;  %s1676_s14 = scalar_lea.vmem (%p1332_p6), %s1758_s4, %s1106_s11 }
  0x3c   : > { %1124 = vmatpush1.bf16.msra.mxu1 %v1123_v63  ;;  %1126 = vmatprep.subr.bf16.mxu0 %v1125_v1  ;;  %v1129_v15 = vpack.c.bf16 %v360_v11, %v352_v10  ;;  %v1137_v18 = vpack.c.bf16 %v362_v14, %v354_v12  ;;  %v353_v19 = vld [vmem:[%s1431_s15 + $0xb0] sm:$0xff]  ;;  %v1131_v22 = vpack.c.bf16 %v359_v17, %v351_v16  ;;  %v764_v12 = vsub.s32 7, %v1520_v27 }
  0x3d   : > { %1134 = vmatprep.subr.bf16.mxu1 %v1133_v5  ;;  %v361_v20 = vld [vmem:[%s1431_s15 + $0xf0] sm:$0xff]  ;;  %s321_s15 = scalar_select %p320_p13, %s1514_s29, 31 }
  0x3e   : > { %1087 = vmatmul.mubr.msk.f32.vlgmr.msra.gmra.mrb[0].mxu0 %vm363_vm0, %v327_v0  ;;  %v1139_v23 = vpack.c.bf16 %v361_v20, %v353_v19 }
  0x3f   : > { %1091 = vmatmul.mubr.msk.f32.vlgmr.msra.gmra.mrb[0].mxu1 %vm363_vm0, %v327_v0  ;;  %1128 = vmatpush1.bf16.msra.mxu0 %v1127_v9  ;;  %s323_s7 = sadd.s32 %s1086_s6, %s321_s15  ;;  %v756_v9 = vsub.s32 5, %v1520_v27 }
  0x40   : > { %1136 = vmatpush1.bf16.msra.mxu1 %v1135_v13  ;;  %446 = vmatprep.mubr.f32.mxu0 %v1257_v32  ;;  %s324_s10 = scalar_lea.vmem %s1755_s1, %s323_s7 }
  0x41   : > { %535 = vmatprep.mubr.f32.mxu1 %v1257_v32  ;;  %1130 = vmatprep.subr.bf16.mxu0 %v1129_v15  ;;  %v1526_v29 = vld [vmem:[%s324_s10] sm:$0xff] }
  0x42   : > { %1088 = vmatmul.mubr.msk.f32.gmra.mrb[2].mxu0 %vm363_vm0, %v328_v21  ;;  %1138 = vmatprep.subr.bf16.mxu1 %v1137_v18  ;;  %v737_v33 = vrot.slane %v1526_v29, %v736_v28  ;;  %v1533_v34 = vrot.slane %v1526_v29, %v744_v30  ;;  %v1536_v35 = vrot.slane %v1526_v29, %v740_v31 }
  0x43   : > { %1092 = vmatmul.mubr.msk.f32.gmra.mrb[2].mxu1 %vm363_vm0, %v328_v21  ;;  %452 = vmatprep.mubr.f32.mxu0 %v1257_v32  ;;  %v1597_v26 = vrot.slane %v1526_v29, %v756_v9  ;;  %v1603_v30 = vrot.slane %v1526_v29, %v764_v12 }
  0x44   : > { %541 = vmatprep.mubr.f32.mxu1 %v1257_v32  ;;  %1132 = vmatpush1.bf16.msra.mxu0 %v1131_v22 }
  0x45   : > { %1140 = vmatpush1.bf16.msra.mxu1 %v1139_v23 }
  0x46   : > { %1089 = vmatmul.mubr.msk.f32.gmra.mrb[4].mxu0 %vm363_vm0, %v329_v24 }
  0x47   : > { %1093 = vmatmul.mubr.msk.f32.gmra.mrb[4].mxu1 %vm363_vm0, %v329_v24  ;;  %458 = vmatprep.mubr.f32.mxu0 %v1257_v32 }
  0x48   : > { %547 = vmatprep.mubr.f32.mxu1 %v1257_v32 }
  0x4a   : > { %1090 = vmatmul.mubr.msk.f32.gmra.mrb[6].mxu0 %vm363_vm0, %v330_v25 }
  0x4b   : > { %1094 = vmatmul.mubr.msk.f32.gmra.mrb[6].mxu1 %vm363_vm0, %v330_v25  ;;  %618 = vmatprep.mubr.f32.mxu0 %v1257_v32 }
  0x4c   : > { %707 = vmatprep.mubr.f32.mxu1 %v1257_v32 }
  0x4e   : > { %1095 = vmatmul.mubr.msk.f32.vlgmr.msra.gmra.mrb[8].mxu0 %vm363_vm0, %v327_v0 }
  0x4f   : > { %1099 = vmatmul.mubr.msk.f32.vlgmr.msra.gmra.mrb[8].mxu1 %vm363_vm0, %v327_v0  ;;  %624 = vmatprep.mubr.f32.mxu0 %v1257_v32 }
  0x50   : > { %713 = vmatprep.mubr.f32.mxu1 %v1257_v32 }
  0x52   : > { %1096 = vmatmul.mubr.msk.f32.gmra.mrb[10].mxu0 %vm363_vm0, %v328_v21 }
  0x53   : > { %1100 = vmatmul.mubr.msk.f32.gmra.mrb[10].mxu1 %vm363_vm0, %v328_v21  ;;  %630 = vmatprep.mubr.f32.mxu0 %v1257_v32  ;;  %v1587_v21 = vrot.slane %v1526_v29, %v752_v4 }
  0x54   : > { %719 = vmatprep.mubr.f32.mxu1 %v1257_v32 }
  0x56   : > { %1097 = vmatmul.mubr.msk.f32.gmra.mrb[12].mxu0 %vm363_vm0, %v329_v24 }
  0x57   : > { %1101 = vmatmul.mubr.msk.f32.gmra.mrb[12].mxu1 %vm363_vm0, %v329_v24  ;;  %636 = vmatprep.mubr.f32.mxu0 %v1257_v32 }
  0x58   : > { %725 = vmatprep.mubr.f32.mxu1 %v1257_v32  ;;  %v748_v32 = vsub.s32 3, %v1520_v27 }
  0x5a   : > { %1098 = vmatmul.mubr.msk.f32.gmra.mrb[14].mxu0 %vm363_vm0, %v330_v25  ;;  %v1541_v37 = vrot.slane %v1526_v29, %v748_v32 }
  0x5b   : > { %1102 = vmatmul.mubr.msk.f32.gmra.mrb[14].mxu1 %vm363_vm0, %v330_v25  ;;  %v1594_v25 = vrot.slane %v1526_v29, %v760_v8 }
  0xb1   : > { %v1538_v36 = vpop.permute.xlu0 %812  ;;  %v1560_v58 = vpop.permute.xlu1 %822 }
  0xb6   : > { %v1549_v50 = vpop.permute.xlu0 %817 }
  0xb8   : > { %v1582_v16 = vpop.permute.xlu1 %827 }
 0x111   : > { %v442_v38 = vpop.f32.mrb[0].mxu0 }
 0x112   : > { %v774_v39 = vmul.f32 %v737_v33, %v442_v38  ;;  %v531_v40 = vpop.f32.mrb[0].mxu1  ;;  %v444_v41 = vpop.f32.mrb[1].mxu0 }
 0x113   : > { %v776_v42 = vmul.f32 %v1533_v34, %v531_v40  ;;  %v775_v43 = vmul.f32 %v1536_v35, %v444_v41  ;;  %v533_v44 = vpop.f32.mrb[1].mxu1 }
 0x114   : > { %v777_v45 = vmul.f32 %v1541_v37, %v533_v44  ;;  %v830_v46 = vadd.f32 %v1538_v36, %v774_v39 }
 0x115   : > { %v831_v47 = vadd.f32 %v1538_v36, %v775_v43  ;;  %v832_v48 = vadd.f32 %v1538_v36, %v776_v42  ;;  %v448_v49 = vpop.f32.mrb[2].mxu0 }
 0x116   : > { %v833_v51 = vadd.f32 %v1538_v36, %v777_v45  ;;  %862 = vst [vmem:[%s1553_s17] sm:$0xff] %v830_v46  ;;  %v782_v52 = vmul.f32 %v737_v33, %v448_v49  ;;  %v537_v53 = vpop.f32.mrb[2].mxu1  ;;  %v450_v54 = vpop.f32.mrb[3].mxu0 }
 0x117   : > { %863 = vst [vmem:[%s1553_s17 + $0x8] sm:$0xff] %v831_v47  ;;  %864 = vst [vmem:[%s1553_s17 + $0x10] sm:$0xff] %v832_v48  ;;  %v784_v55 = vmul.f32 %v1533_v34, %v537_v53  ;;  %v783_v56 = vmul.f32 %v1536_v35, %v450_v54  ;;  %v539_v57 = vpop.f32.mrb[3].mxu1 }
 0x118   : > { %865 = vst [vmem:[%s1553_s17 + $0x18] sm:$0xff] %v833_v51  ;;  %v785_v59 = vmul.f32 %v1541_v37, %v539_v57  ;;  %v838_v60 = vadd.f32 %v1549_v50, %v782_v52 }
 0x119   : > { %v839_v61 = vadd.f32 %v1549_v50, %v783_v56  ;;  %v840_v62 = vadd.f32 %v1549_v50, %v784_v55  ;;  %v454_v63 = vpop.f32.mrb[4].mxu0 }
 0x11a   : > { %v841_v0 = vadd.f32 %v1549_v50, %v785_v59  ;;  %870 = vst [vmem:[%s1553_s17 + $0x40] sm:$0xff] %v838_v60  ;;  %v790_v1 = vmul.f32 %v737_v33, %v454_v63  ;;  %v543_v2 = vpop.f32.mrb[4].mxu1  ;;  %v456_v3 = vpop.f32.mrb[5].mxu0 }
 0x11b   : > { %871 = vst [vmem:[%s1553_s17 + $0x48] sm:$0xff] %v839_v61  ;;  %872 = vst [vmem:[%s1553_s17 + $0x50] sm:$0xff] %v840_v62  ;;  %v792_v5 = vmul.f32 %v1533_v34, %v543_v2  ;;  %v791_v6 = vmul.f32 %v1536_v35, %v456_v3  ;;  %v545_v7 = vpop.f32.mrb[5].mxu1 }
 0x11c   : > { %873 = vst [vmem:[%s1553_s17 + $0x58] sm:$0xff] %v841_v0  ;;  %v793_v10 = vmul.f32 %v1541_v37, %v545_v7  ;;  %v846_v11 = vadd.f32 %v1560_v58, %v790_v1 }
 0x11d   : > { %v847_v13 = vadd.f32 %v1560_v58, %v791_v6  ;;  %v848_v14 = vadd.f32 %v1560_v58, %v792_v5  ;;  %v460_v15 = vpop.f32.mrb[6].mxu0 }
 0x11e   : > { %v849_v17 = vadd.f32 %v1560_v58, %v793_v10  ;;  %878 = vst [vmem:[%s1553_s17 + $0x80] sm:$0xff] %v846_v11  ;;  %v798_v18 = vmul.f32 %v737_v33, %v460_v15  ;;  %v549_v19 = vpop.f32.mrb[6].mxu1  ;;  %v462_v20 = vpop.f32.mrb[7].mxu0 }
 0x11f   : > { %879 = vst [vmem:[%s1553_s17 + $0x88] sm:$0xff] %v847_v13  ;;  %880 = vst [vmem:[%s1553_s17 + $0x90] sm:$0xff] %v848_v14  ;;  %v800_v22 = vmul.f32 %v1533_v34, %v549_v19  ;;  %v799_v23 = vmul.f32 %v1536_v35, %v462_v20  ;;  %v551_v24 = vpop.f32.mrb[7].mxu1  ;;  %v922_v19 = vld [vmem:[%s1553_s17 + $0x10] sm:$0xff] (%p1332_p6)  ;;  %v924_v20 = vld [vmem:[%s1553_s17 + $0x18] sm:$0xff] (%p1332_p6) }
 0x120   : > { %881 = vst [vmem:[%s1553_s17 + $0x98] sm:$0xff] %v849_v17  ;;  %v801_v27 = vmul.f32 %v1541_v37, %v551_v24  ;;  %v854_v28 = vadd.f32 %v1582_v16, %v798_v18  ;;  %v920_v18 = vld [vmem:[%s1553_s17 + $0x8] sm:$0xff] (%p1332_p6)  ;;  %923 = vst [vmem:[%s1676_s14 + $0x10] sm:$0xff] (%p1332_p6), %v922_v19 }
 0x121   : > { %v855_v31 = vadd.f32 %v1582_v16, %v799_v23  ;;  %v856_v32 = vadd.f32 %v1582_v16, %v800_v22  ;;  %v620_v33 = vpop.f32.mrb[8].mxu0  ;;  %921 = vst [vmem:[%s1676_s14 + $0x8] sm:$0xff] (%p1332_p6), %v920_v18  ;;  %925 = vst [vmem:[%s1676_s14 + $0x18] sm:$0xff] (%p1332_p6), %v924_v20 }
 0x122   : > { %v857_v34 = vadd.f32 %v1582_v16, %v801_v27  ;;  %886 = vst [vmem:[%s1553_s17 + $0xc0] sm:$0xff] %v854_v28  ;;  %v778_v35 = vmul.f32 %v1587_v21, %v620_v33  ;;  %v709_v38 = vpop.f32.mrb[8].mxu1  ;;  %v622_v39 = vpop.f32.mrb[9].mxu0  ;;  %v938_v27 = vld [vmem:[%s1553_s17 + $0x50] sm:$0xff] (%p1332_p6) }
 0x123   : > { %887 = vst [vmem:[%s1553_s17 + $0xc8] sm:$0xff] %v855_v31  ;;  %888 = vst [vmem:[%s1553_s17 + $0xd0] sm:$0xff] %v856_v32  ;;  %v780_v29 = vmul.f32 %v1594_v25, %v709_v38  ;;  %v779_v37 = vmul.f32 %v1597_v26, %v622_v39  ;;  %v711_v40 = vpop.f32.mrb[9].mxu1  ;;  %v940_v28 = vld [vmem:[%s1553_s17 + $0x58] sm:$0xff] (%p1332_p6) }
 0x124   : > { %889 = vst [vmem:[%s1553_s17 + $0xd8] sm:$0xff] %v857_v34  ;;  %v834_v41 = vadd.f32 %v1538_v36, %v778_v35  ;;  %v781_v42 = vmul.f32 %v1603_v30, %v711_v40  ;;  %939 = vst [vmem:[%s1676_s14 + $0x110] sm:$0xff] (%p1332_p6), %v938_v27 }
 0x125   : > { %v836_v43 = vadd.f32 %v1538_v36, %v780_v29  ;;  %v835_v44 = vadd.f32 %v1538_v36, %v779_v37  ;;  %v626_v45 = vpop.f32.mrb[10].mxu0  ;;  %941 = vst [vmem:[%s1676_s14 + $0x118] sm:$0xff] (%p1332_p6), %v940_v28  ;;  %v950_v34 = vld [vmem:[%s1553_s17 + $0x80] sm:$0xff] (%p1332_p6) }
 0x126   : > { %866 = vst [vmem:[%s1553_s17 + $0x20] sm:$0xff] %v834_v41  ;;  %v837_v46 = vadd.f32 %v1538_v36, %v781_v42  ;;  %v786_v47 = vmul.f32 %v1587_v21, %v626_v45  ;;  %v715_v48 = vpop.f32.mrb[10].mxu1  ;;  %v628_v49 = vpop.f32.mrb[11].mxu0  ;;  %v952_v35 = vld [vmem:[%s1553_s17 + $0x88] sm:$0xff] (%p1332_p6)  ;;  %951 = vst [vmem:[%s1676_s14 + $0x200] sm:$0xff] (%p1332_p6), %v950_v34  ;;  %v954_v38 = vld [vmem:[%s1553_s17 + $0x90] sm:$0xff] (%p1332_p6) }
 0x127   : > { %868 = vst [vmem:[%s1553_s17 + $0x30] sm:$0xff] %v836_v43  ;;  %867 = vst [vmem:[%s1553_s17 + $0x28] sm:$0xff] %v835_v44  ;;  %v788_v51 = vmul.f32 %v1594_v25, %v715_v48  ;;  %v787_v52 = vmul.f32 %v1597_v26, %v628_v49  ;;  %v717_v53 = vpop.f32.mrb[11].mxu1  ;;  %v956_v39 = vld [vmem:[%s1553_s17 + $0x98] sm:$0xff] (%p1332_p6) }
 0x128   : > { %869 = vst [vmem:[%s1553_s17 + $0x38] sm:$0xff] %v837_v46  ;;  %v842_v54 = vadd.f32 %v1549_v50, %v786_v47  ;;  %v789_v55 = vmul.f32 %v1603_v30, %v717_v53  ;;  %953 = vst [vmem:[%s1676_s14 + $0x208] sm:$0xff] (%p1332_p6), %v952_v35 }
 0x129   : > { %v844_v36 = vadd.f32 %v1549_v50, %v788_v51  ;;  %v843_v56 = vadd.f32 %v1549_v50, %v787_v52  ;;  %v632_v57 = vpop.f32.mrb[12].mxu0  ;;  %955 = vst [vmem:[%s1676_s14 + $0x210] sm:$0xff] (%p1332_p6), %v954_v38  ;;  %957 = vst [vmem:[%s1676_s14 + $0x218] sm:$0xff] (%p1332_p6), %v956_v39  ;;  %v966_v42 = vld [vmem:[%s1553_s17 + $0xc0] sm:$0xff] (%p1332_p6) }
 0x12a   : > { %874 = vst [vmem:[%s1553_s17 + $0x60] sm:$0xff] %v842_v54  ;;  %v845_v59 = vadd.f32 %v1549_v50, %v789_v55  ;;  %v794_v60 = vmul.f32 %v1587_v21, %v632_v57  ;;  %v721_v61 = vpop.f32.mrb[12].mxu1  ;;  %v634_v62 = vpop.f32.mrb[13].mxu0  ;;  %v968_v43 = vld [vmem:[%s1553_s17 + $0xc8] sm:$0xff] (%p1332_p6)  ;;  %v970_v44 = vld [vmem:[%s1553_s17 + $0xd0] sm:$0xff] (%p1332_p6)  ;;  %967 = vst [vmem:[%s1676_s14 + $0x300] sm:$0xff] (%p1332_p6), %v966_v42 }
 0x12b   : > { %876 = vst [vmem:[%s1553_s17 + $0x70] sm:$0xff] %v844_v36  ;;  %875 = vst [vmem:[%s1553_s17 + $0x68] sm:$0xff] %v843_v56  ;;  %v796_v63 = vmul.f32 %v1594_v25, %v721_v61  ;;  %v795_v0 = vmul.f32 %v1597_v26, %v634_v62  ;;  %v723_v1 = vpop.f32.mrb[13].mxu1  ;;  %v972_v45 = vld [vmem:[%s1553_s17 + $0xd8] sm:$0xff] (%p1332_p6) }
 0x12c   : > { %877 = vst [vmem:[%s1553_s17 + $0x78] sm:$0xff] %v845_v59  ;;  %v850_v2 = vadd.f32 %v1560_v58, %v794_v60  ;;  %v797_v3 = vmul.f32 %v1603_v30, %v723_v1  ;;  %969 = vst [vmem:[%s1676_s14 + $0x308] sm:$0xff] (%p1332_p6), %v968_v43 }
 0x12d   : > { %v852_v50 = vadd.f32 %v1560_v58, %v796_v63  ;;  %v851_v4 = vadd.f32 %v1560_v58, %v795_v0  ;;  %v638_v5 = vpop.f32.mrb[14].mxu0  ;;  %971 = vst [vmem:[%s1676_s14 + $0x310] sm:$0xff] (%p1332_p6), %v970_v44  ;;  %973 = vst [vmem:[%s1676_s14 + $0x318] sm:$0xff] (%p1332_p6), %v972_v45 }
 0x12e   : > { %882 = vst [vmem:[%s1553_s17 + $0xa0] sm:$0xff] %v850_v2  ;;  %v853_v6 = vadd.f32 %v1560_v58, %v797_v3  ;;  %v802_v7 = vmul.f32 %v1587_v21, %v638_v5  ;;  %v727_v8 = vpop.f32.mrb[14].mxu1  ;;  %v640_v9 = vpop.f32.mrb[15].mxu0  ;;  %900 = sbr.rel (!%p1332_p6) target bundleno = 317 (0x13d), region = 63  ;;  %v926_v21 = vld [vmem:[%s1553_s17 + $0x20] sm:$0xff] (%p1332_p6)  ;;  %v928_v22 = vld [vmem:[%s1553_s17 + $0x28] sm:$0xff] (%p1332_p6) }
 0x12f   : > { %884 = vst [vmem:[%s1553_s17 + $0xb0] sm:$0xff] %v852_v50  ;;  %883 = vst [vmem:[%s1553_s17 + $0xa8] sm:$0xff] %v851_v4  ;;  %v804_v10 = vmul.f32 %v1594_v25, %v727_v8  ;;  %v803_v11 = vmul.f32 %v1597_v26, %v640_v9  ;;  %v729_v12 = vpop.f32.mrb[15].mxu1  ;;  %v930_v23 = vld [vmem:[%s1553_s17 + $0x30] sm:$0xff] (%p1332_p6)  ;;  %v932_v24 = vld [vmem:[%s1553_s17 + $0x38] sm:$0xff] (%p1332_p6) }
 0x130   : > { %885 = vst [vmem:[%s1553_s17 + $0xb8] sm:$0xff] %v853_v6  ;;  %v858_v13 = vadd.f32 %v1582_v16, %v802_v7  ;;  %v805_v14 = vmul.f32 %v1603_v30, %v729_v12  ;;  %v934_v25 = vld [vmem:[%s1553_s17 + $0x40] sm:$0xff] (%p1332_p6)  ;;  %v936_v26 = vld [vmem:[%s1553_s17 + $0x48] sm:$0xff] (%p1332_p6)  ;;  %927 = vst [vmem:[%s1676_s14 + $0x20] sm:$0xff] (%p1332_p6), %v926_v21 }
 0x131   : > { %v860_v58 = vadd.f32 %v1582_v16, %v804_v10  ;;  %v859_v15 = vadd.f32 %v1582_v16, %v803_v11  ;;  %929 = vst [vmem:[%s1676_s14 + $0x28] sm:$0xff] (%p1332_p6), %v928_v22  ;;  %931 = vst [vmem:[%s1676_s14 + $0x30] sm:$0xff] (%p1332_p6), %v930_v23  ;;  %v942_v30 = vld [vmem:[%s1553_s17 + $0x60] sm:$0xff] (%p1332_p6) }
 0x132   : > { %890 = vst [vmem:[%s1553_s17 + $0xe0] sm:$0xff] %v858_v13  ;;  %v861_v17 = vadd.f32 %v1582_v16, %v805_v14  ;;  %v918_v16 = vld [vmem:[%s1553_s17] sm:$0xff] (%p1332_p6)  ;;  %933 = vst [vmem:[%s1676_s14 + $0x38] sm:$0xff] (%p1332_p6), %v932_v24  ;;  %v944_v31 = vld [vmem:[%s1553_s17 + $0x68] sm:$0xff] (%p1332_p6) }
 0x133   : > { %892 = vst [vmem:[%s1553_s17 + $0xf0] sm:$0xff] %v860_v58  ;;  %891 = vst [vmem:[%s1553_s17 + $0xe8] sm:$0xff] %v859_v15  ;;  %v946_v32 = vld [vmem:[%s1553_s17 + $0x70] sm:$0xff] (%p1332_p6)  ;;  %v948_v33 = vld [vmem:[%s1553_s17 + $0x78] sm:$0xff] (%p1332_p6) }
 0x134   : > { %893 = vst [vmem:[%s1553_s17 + $0xf8] sm:$0xff] %v861_v17  ;;  %919 = vst [vmem:[%s1676_s14] sm:$0xff] (%p1332_p6), %v918_v16 }
 0x135   : > { %935 = vst [vmem:[%s1676_s14 + $0x100] sm:$0xff] %v934_v25  ;;  %937 = vst [vmem:[%s1676_s14 + $0x108] sm:$0xff] %v936_v26  ;;  %v958_v29 = vld [vmem:[%s1553_s17 + $0xa0] sm:$0xff] }
 0x136   : > { %943 = vst [vmem:[%s1676_s14 + $0x120] sm:$0xff] %v942_v30  ;;  %945 = vst [vmem:[%s1676_s14 + $0x128] sm:$0xff] %v944_v31  ;;  %v960_v37 = vld [vmem:[%s1553_s17 + $0xa8] sm:$0xff]  ;;  %v962_v40 = vld [vmem:[%s1553_s17 + $0xb0] sm:$0xff] }
 0x137   : > { %947 = vst [vmem:[%s1676_s14 + $0x130] sm:$0xff] %v946_v32  ;;  %949 = vst [vmem:[%s1676_s14 + $0x138] sm:$0xff] %v948_v33  ;;  %v964_v41 = vld [vmem:[%s1553_s17 + $0xb8] sm:$0xff] }
 0x138   : > { %959 = vst [vmem:[%s1676_s14 + $0x220] sm:$0xff] %v958_v29  ;;  %961 = vst [vmem:[%s1676_s14 + $0x228] sm:$0xff] %v960_v37 }
 0x139   : > { %963 = vst [vmem:[%s1676_s14 + $0x230] sm:$0xff] %v962_v40  ;;  %965 = vst [vmem:[%s1676_s14 + $0x238] sm:$0xff] %v964_v41  ;;  %v974_v46 = vld [vmem:[%s1553_s17 + $0xe0] sm:$0xff] }
 0x13a   : > { %v976_v47 = vld [vmem:[%s1553_s17 + $0xe8] sm:$0xff]  ;;  %975 = vst [vmem:[%s1676_s14 + $0x320] sm:$0xff] %v974_v46  ;;  %v978_v48 = vld [vmem:[%s1553_s17 + $0xf0] sm:$0xff] }
 0x13b   : > { %977 = vst [vmem:[%s1676_s14 + $0x328] sm:$0xff] %v976_v47  ;;  %v980_v49 = vld [vmem:[%s1553_s17 + $0xf8] sm:$0xff]  ;;  %979 = vst [vmem:[%s1676_s14 + $0x330] sm:$0xff] %v978_v48 }
 0x13c   : > { %981 = vst [vmem:[%s1676_s14 + $0x338] sm:$0xff] %v980_v49 }
 0x13d PF: > { %s14_s21 = sadd.s32 1, %s1255_s21   ;;  %s1760_s15 = smov %s1235_s16 }
 0x13e   : > { %p11_p0 = scmp.ge.s32.totalorder %s14_s21, 10   ;;  %s1761_s16 = smov %s1340_s30 }
 0x13f   : > { %s1762_s17 = smov %s1247_s19  ;;  %s1763_s18 = smov %s1251_s20 }
 0x140   : > { %s1764_s19 = smov %s1767_s22  ;;  %s1765_s20 = smov %s1771_s23 }
 0x141   :  { %13 = sbr.rel (!%p11_p0) target bundleno = 4 (0x4), region = 120 }

</bundles_post_ra>
